<compile_context>
chip_gen: v6e
topology: v6e:2x2x1
jax: 0.10.0
libtpu: 0.0.40
codegen_flags: <defaults>
</compile_context>

<pallas_src>
import jax
import jax.numpy as jnp
import numpy as np
from jax.experimental import pallas as pl
from jax.experimental.pallas import tpu as pltpu


def _round_up(x, m):
    return ((x + m - 1) // m) * m


def _lstm_cell_update(g, c_prev, H):
    """g: (BP, 4H) f32 pre-activations in PyTorch gate order (i, f, g, o)."""
    if H >= 64:
        # Production-sized gates: only 4H lanes of transcendentals (EUP is 1 slot
        # and sits on the serial recurrence path).
        i_g = jax.nn.sigmoid(g[:, 0:H])
        f_g = jax.nn.sigmoid(g[:, H:2 * H])
        g_g = jnp.tanh(g[:, 2 * H:3 * H])
        o_g = jax.nn.sigmoid(g[:, 3 * H:4 * H])
    else:
        # Toy H: 4H fits one vreg lane span; full-vreg sigmoid/tanh, slice after.
        sig = jax.nn.sigmoid(g)
        th = jnp.tanh(g)
        i_g = sig[:, 0:H]
        f_g = sig[:, H:2 * H]
        g_g = th[:, 2 * H:3 * H]
        o_g = sig[:, 3 * H:4 * H]
    c_new = f_g * c_prev + i_g * g_g
    h_new = o_g * jnp.tanh(c_new)
    return h_new, c_new


# ----------------------------------------------------------------------------
# Fused kernel factory: (embedding+layer0 projection) -> wavefront LSTM stack
# -> per-step fused final linear.  Single pallas_call, everything in VMEM.
# ----------------------------------------------------------------------------
def _make_texlstm_kernel(n_layers, hidden_sizes, seq_len, batch_pad):
    T, BP = seq_len, batch_pad
    TB = T * BP
    H = list(hidden_sizes)

    def kernel(*refs):
        idx = 0
        tok_ref = refs[idx]; idx += 1          # (TB, 1)   int32, time-major padded batch
        embw0_ref = refs[idx]; idx += 1        # (VP, 4H0) bf16  = pad(emb) @ W_ih0
        whh0_ref = refs[idx]; idx += 1         # (H0, 4H0) bf16
        b0_ref = refs[idx]; idx += 1           # (1, 4H0)  f32
        upper = []
        for _ in range(1, n_layers):
            upper.append((refs[idx], refs[idx + 1], refs[idx + 2]))  # wih bf16, whh bf16, b f32
            idx += 3
        wlin_ref = refs[idx]; idx += 1         # (H_last, FP) bf16
        blin_ref = refs[idx]; idx += 1         # (1, FP)      f32
        out_ref = refs[idx]                    # (TB, FP)     f32

        VP = embw0_ref.shape[0]

        # --- Embedding + layer-0 input projection as ONE lane-dense MXU GEMM. ---
        tok = tok_ref[...]                                            # (TB, 1)
        vocab_iota = jax.lax.broadcasted_iota(jnp.int32, (TB, VP), 1)
        onehot = (vocab_iota == tok).astype(jnp.bfloat16)             # (TB, VP) bf16
        pre0 = jnp.dot(onehot, embw0_ref[...],
                       preferred_element_type=jnp.float32) + b0_ref[...]   # (TB, 4H0) f32

        # Hoist all weight loads out of the recurrence (bf16 stays in vregs/VMEM).
        whh = [whh0_ref[...]] + [u[1][...] for u in upper]
        wih = [None] + [u[0][...] for u in upper]
        bias = [None] + [u[2][...] for u in upper]
        wlin = wlin_ref[...]
        blin = blin_ref[...]

        h = [jnp.zeros((BP, H[l]), jnp.float32) for l in range(n_layers)]
        c = [jnp.zeros((BP, H[l]), jnp.float32) for l in range(n_layers)]
        prev_out = [None] * n_layers           # layer l's output from the previous step

        # --- Wavefront: at step s, layer l processes timestep t = s - l, using
        #     layer (l-1)'s hidden state produced at step s-1.  Active layers in
        #     a step are mutually independent -> overlapping serial chains. ---
        for s in range(T + n_layers - 1):
            new_out = list(prev_out)
            for l in range(n_layers):
                t = s - l
                if not (0 <= t < T):
                    continue
                if l == 0:
                    g = pre0[t * BP:(t + 1) * BP, :] + jnp.dot(
                        h[0].astype(jnp.bfloat16), whh[0],
                        preferred_element_type=jnp.float32)
                else:
                    g = (jnp.dot(prev_out[l - 1].astype(jnp.bfloat16), wih[l],
                                 preferred_element_type=jnp.float32)
                         + jnp.dot(h[l].astype(jnp.bfloat16), whh[l],
                                   preferred_element_type=jnp.float32)
                         + bias[l])
                h[l], c[l] = _lstm_cell_update(g, c[l], H[l])
                new_out[l] = h[l]
                if l == n_layers - 1:
                    # Final linear fused per timestep: one lane-dense (BP, FP) store.
                    y = jnp.dot(h[l].astype(jnp.bfloat16), wlin,
                                preferred_element_type=jnp.float32) + blin
                    out_ref[pl.ds(t * BP, BP), :] = y.astype(out_ref.dtype)
            prev_out = new_out

    return kernel


# ----------------------------------------------------------------------------
# Wrapper: pad / fold / cast in XLA glue, run one pallas_call, un-pad result.
# ----------------------------------------------------------------------------
def texlstm_forward(params, tokens):
    """tokens: (B, T) int32 -> (B, T, n_units[-1]) float32."""
    B, T = tokens.shape
    BP = _round_up(max(B, 1), 8)                  # pad batch to sublane multiple
    lstm_params = params["lstm"]
    n_layers = len(lstm_params)
    hidden_sizes = [lp["w_hh_t"].shape[0] for lp in lstm_params]

    emb = params["embedding"]                     # (V, E)
    V, _ = emb.shape
    VP = _round_up(V, 128)                        # lane-align the one-hot contraction
    emb_p = jnp.pad(emb, ((0, VP - V), (0, 0)))

    # Fold embedding into layer-0's input projection (f32 GEMM in the wrapper,
    # rounded once to bf16 for the MXU).
    emb_w0 = (emb_p @ lstm_params[0]["w_ih_t"]).astype(jnp.bfloat16)   # (VP, 4H0)

    # Time-major tokens, batch padded (with index 0), flattened to (T*BP, 1).
    tok_tb = jnp.transpose(tokens.astype(jnp.int32), (1, 0))   # (T, B)
    tok_tb = jnp.pad(tok_tb, ((0, 0), (0, BP - B)))            # (T, BP)
    tok_flat = tok_tb.reshape(T * BP, 1)

    w_lin = params["linear"]["w_t"]               # (H_last, Fout)
    b_lin = params["linear"]["bias"]              # (1, Fout)
    Fout = w_lin.shape[1]
    FP = _round_up(Fout, 128)                     # lane-dense output slab
    w_lin_p = jnp.pad(w_lin, ((0, 0), (0, FP - Fout))).astype(jnp.bfloat16)
    b_lin_p = jnp.pad(b_lin, ((0, 0), (0, FP - Fout)))

    inputs = [tok_flat, emb_w0,
              lstm_params[0]["w_hh_t"].astype(jnp.bfloat16),
              lstm_params[0]["bias"]]
    for lp in lstm_params[1:]:
        inputs += [lp["w_ih_t"].astype(jnp.bfloat16),
                   lp["w_hh_t"].astype(jnp.bfloat16),
                   lp["bias"]]
    inputs += [w_lin_p, b_lin_p]

    kernel = _make_texlstm_kernel(n_layers, hidden_sizes, T, BP)

    out2d = pl.pallas_call(
        kernel,
        out_shape=jax.ShapeDtypeStruct((T * BP, FP), jnp.float32),
        in_specs=[pl.BlockSpec(memory_space=pltpu.MemorySpace.VMEM)] * len(inputs),
        out_specs=pl.BlockSpec(memory_space=pltpu.MemorySpace.VMEM),
    )(*inputs)

    # Drop batch padding and lane padding, back to PyTorch batch-first layout.
    out = out2d.reshape(T, BP, FP)[:, :B, :Fout]  # (T, B, Fout)
    return jnp.transpose(out, (1, 0, 2))          # (B, T, Fout)


# ----------------------------------------------------------------------------
# Deterministic parameter init mirroring the PyTorch module's shapes.
# ----------------------------------------------------------------------------
def init_texlstm_params(key, vocab_size, embedding_dim, n_lstm_cells, n_units):
    params = {}
    key, k_emb = jax.random.split(key)
    params["embedding"] = jax.random.normal(
        k_emb, (vocab_size, embedding_dim), dtype=jnp.float32
    )

    lstm_params = []
    in_dim = embedding_dim
    for i in range(n_lstm_cells):
        H = n_units[i]
        bound = 1.0 / np.sqrt(H)
        key, k1, k2, k3, k4 = jax.random.split(key, 5)
        w_ih = jax.random.uniform(k1, (4 * H, in_dim), jnp.float32, -bound, bound)
        w_hh = jax.random.uniform(k2, (4 * H, H), jnp.float32, -bound, bound)
        b_ih = jax.random.uniform(k3, (4 * H,), jnp.float32, -bound, bound)
        b_hh = jax.random.uniform(k4, (4 * H,), jnp.float32, -bound, bound)
        lstm_params.append(
            dict(
                w_ih_t=w_ih.T,                         # (in_dim, 4H)
                w_hh_t=w_hh.T,                         # (H, 4H)
                bias=(b_ih + b_hh).reshape(1, 4 * H),  # (1, 4H)
            )
        )
        in_dim = H
    params["lstm"] = lstm_params

    fin, fout = n_units[-2], n_units[-1]
    bound = 1.0 / np.sqrt(fin)
    key, k1, k2 = jax.random.split(key, 3)
    w = jax.random.uniform(k1, (fout, fin), jnp.float32, -bound, bound)
    b = jax.random.uniform(k2, (fout,), jnp.float32, -bound, bound)
    params["linear"] = dict(w_t=w.T, bias=b.reshape(1, fout))
    return params


# ----------------------------------------------------------------------------
# Pure-JAX f32 reference (sanity check).
# ----------------------------------------------------------------------------
def texlstm_reference(params, tokens):
    emb = jnp.take(params["embedding"], tokens, axis=0)  # (B, T, E)
    x = jnp.transpose(emb, (1, 0, 2))                    # (T, B, E)

    for lp in params["lstm"]:
        _, B, _ = x.shape
        H = lp["w_hh_t"].shape[0]
        h = jnp.zeros((B, H), jnp.float32)
        c = jnp.zeros((B, H), jnp.float32)

        def step(carry, xt):
            h, c = carry
            gates = xt @ lp["w_ih_t"] + h @ lp["w_hh_t"] + lp["bias"]
            i_g = jax.nn.sigmoid(gates[:, 0:H])
            f_g = jax.nn.sigmoid(gates[:, H:2 * H])
            g_g = jnp.tanh(gates[:, 2 * H:3 * H])
            o_g = jax.nn.sigmoid(gates[:, 3 * H:4 * H])
            c_new = f_g * c + i_g * g_g
            h_new = o_g * jnp.tanh(c_new)
            return (h_new, c_new), h_new

        (_, _), ys = jax.lax.scan(step, (h, c), x)
        x = ys

    x_bt = jnp.transpose(x, (1, 0, 2))
    return x_bt @ params["linear"]["w_t"] + params["linear"]["bias"]


if __name__ == "__main__":
    vocab_size = 50
    embedding_dim = 16
    n_lstm_cells = 2
    n_units = (32, 32, 8)   # two LSTM hidden sizes + final linear output size
    batch, seq = 2, 8

    key = jax.random.PRNGKey(0)
    key, k_tok, k_par = jax.random.split(key, 3)
    tokens = jax.random.randint(k_tok, (batch, seq), 0, vocab_size, dtype=jnp.int32)
    params = init_texlstm_params(k_par, vocab_size, embedding_dim, n_lstm_cells, n_units)

    out = texlstm_forward(params, tokens)
    out = jax.block_until_ready(out)

    ref = jax.block_until_ready(texlstm_reference(params, tokens))
    assert out.shape == (batch, seq, n_units[-1]), out.shape
    assert np.all(np.isfinite(np.asarray(out)))
    # bf16 MXU operands (f32 accumulation) -> slightly looser tolerance vs f32 ref.
    assert np.allclose(np.asarray(out), np.asarray(ref), rtol=3e-2, atol=3e-2)

    print("KERNEL_OK")
</pallas_src>

<mosaic_0001>
module attributes {stable_mosaic.version = 11 : i64} {
  func.func @kernel(%arg0: memref<64x1xi32, #tpu.memory_space<vmem>>, %arg1: memref<128x128xbf16, #tpu.memory_space<vmem>>, %arg2: memref<32x128xbf16, #tpu.memory_space<vmem>>, %arg3: memref<1x128xf32, #tpu.memory_space<vmem>>, %arg4: memref<32x128xbf16, #tpu.memory_space<vmem>>, %arg5: memref<32x128xbf16, #tpu.memory_space<vmem>>, %arg6: memref<1x128xf32, #tpu.memory_space<vmem>>, %arg7: memref<32x128xbf16, #tpu.memory_space<vmem>>, %arg8: memref<1x128xf32, #tpu.memory_space<vmem>>, %arg9: memref<64x128xf32, #tpu.memory_space<vmem>>) attributes {dimension_semantics = [], scalar_prefetch = 0 : i64, scratch_operands = 0 : i64, tpu.core_type = #tpu.core_type<tc>} {
    %c0 = arith.constant 0 : index
    %c0_0 = arith.constant 0 : index
    %0 = vector.load %arg0[%c0, %c0_0] : memref<64x1xi32, #tpu.memory_space<vmem>>, vector<64x1xi32>
    %1 = tpu.iota {dimensions = array<i32: 1>} : vector<64x128xi32>
    %2 = vector.broadcast %0 : vector<64x1xi32> to vector<64x128xi32>
    %3 = arith.cmpi eq, %1, %2 : vector<64x128xi32>
    %4 = arith.extui %3 : vector<64x128xi1> to vector<64x128xi32>
    %5 = arith.sitofp %4 : vector<64x128xi32> to vector<64x128xf32>
    %6 = arith.truncf %5 : vector<64x128xf32> to vector<64x128xbf16>
    %c0_1 = arith.constant 0 : index
    %c0_2 = arith.constant 0 : index
    %7 = vector.load %arg1[%c0_1, %c0_2] : memref<128x128xbf16, #tpu.memory_space<vmem>>, vector<128x128xbf16>
    %cst = arith.constant dense<0.000000e+00> : vector<64x128xf32>
    %8 = tpu.matmul %6, %7, %cst {dimension_numbers = #tpu.dot_dimension_numbers<[1], [0], [0], [1], [0, 0, 1, 1], [], []>} : vector<64x128xbf16>, vector<128x128xbf16>, vector<64x128xf32> -> vector<64x128xf32>
    %c0_3 = arith.constant 0 : index
    %c0_4 = arith.constant 0 : index
    %9 = vector.load %arg3[%c0_3, %c0_4] : memref<1x128xf32, #tpu.memory_space<vmem>>, vector<1x128xf32>
    %10 = vector.broadcast %9 : vector<1x128xf32> to vector<64x128xf32>
    %11 = arith.addf %8, %10 : vector<64x128xf32>
    %c0_5 = arith.constant 0 : index
    %c0_6 = arith.constant 0 : index
    %12 = vector.load %arg2[%c0_5, %c0_6] : memref<32x128xbf16, #tpu.memory_space<vmem>>, vector<32x128xbf16>
    %c0_7 = arith.constant 0 : index
    %c0_8 = arith.constant 0 : index
    %13 = vector.load %arg5[%c0_7, %c0_8] : memref<32x128xbf16, #tpu.memory_space<vmem>>, vector<32x128xbf16>
    %c0_9 = arith.constant 0 : index
    %c0_10 = arith.constant 0 : index
    %14 = vector.load %arg4[%c0_9, %c0_10] : memref<32x128xbf16, #tpu.memory_space<vmem>>, vector<32x128xbf16>
    %c0_11 = arith.constant 0 : index
    %c0_12 = arith.constant 0 : index
    %15 = vector.load %arg6[%c0_11, %c0_12] : memref<1x128xf32, #tpu.memory_space<vmem>>, vector<1x128xf32>
    %c0_13 = arith.constant 0 : index
    %c0_14 = arith.constant 0 : index
    %16 = vector.load %arg7[%c0_13, %c0_14] : memref<32x128xbf16, #tpu.memory_space<vmem>>, vector<32x128xbf16>
    %c0_15 = arith.constant 0 : index
    %c0_16 = arith.constant 0 : index
    %17 = vector.load %arg8[%c0_15, %c0_16] : memref<1x128xf32, #tpu.memory_space<vmem>>, vector<1x128xf32>
    %cst_17 = arith.constant 0.000000e+00 : f32
    %18 = vector.broadcast %cst_17 : f32 to vector<8x32xf32>
    %cst_18 = arith.constant 0.000000e+00 : f32
    %19 = vector.broadcast %cst_18 : f32 to vector<8x32xf32>
    %cst_19 = arith.constant 0.000000e+00 : f32
    %20 = vector.broadcast %cst_19 : f32 to vector<8x32xf32>
    %cst_20 = arith.constant 0.000000e+00 : f32
    %21 = vector.broadcast %cst_20 : f32 to vector<8x32xf32>
    %22 = vector.extract_strided_slice %11 {offsets = [0, 0], sizes = [8, 128], strides = [1, 1]} : vector<64x128xf32> to vector<8x128xf32>
    %23 = arith.truncf %18 : vector<8x32xf32> to vector<8x32xbf16>
    %cst_21 = arith.constant dense<0.000000e+00> : vector<8x128xf32>
    %24 = tpu.matmul %23, %12, %cst_21 {dimension_numbers = #tpu.dot_dimension_numbers<[1], [0], [0], [1], [0, 0, 1, 1], [], []>} : vector<8x32xbf16>, vector<32x128xbf16>, vector<8x128xf32> -> vector<8x128xf32>
    %25 = arith.addf %22, %24 : vector<8x128xf32>
    %26 = arith.negf %25 : vector<8x128xf32>
    %27 = math.exp %26 : vector<8x128xf32>
    %cst_22 = arith.constant 1.000000e+00 : f32
    %28 = vector.broadcast %cst_22 : f32 to vector<8x128xf32>
    %29 = arith.addf %28, %27 : vector<8x128xf32>
    %30 = arith.divf %28, %29 : vector<8x128xf32>
    %31 = math.tanh %25 : vector<8x128xf32>
    %32 = vector.extract_strided_slice %30 {offsets = [0, 0], sizes = [8, 32], strides = [1, 1]} : vector<8x128xf32> to vector<8x32xf32>
    %33 = vector.extract_strided_slice %30 {offsets = [0, 32], sizes = [8, 32], strides = [1, 1]} : vector<8x128xf32> to vector<8x32xf32>
    %34 = vector.extract_strided_slice %31 {offsets = [0, 64], sizes = [8, 32], strides = [1, 1]} : vector<8x128xf32> to vector<8x32xf32>
    %35 = vector.extract_strided_slice %30 {offsets = [0, 96], sizes = [8, 32], strides = [1, 1]} : vector<8x128xf32> to vector<8x32xf32>
    %36 = arith.mulf %33, %20 : vector<8x32xf32>
    %37 = arith.mulf %32, %34 : vector<8x32xf32>
    %38 = arith.addf %36, %37 : vector<8x32xf32>
    %39 = math.tanh %38 : vector<8x32xf32>
    %40 = arith.mulf %35, %39 : vector<8x32xf32>
    %41 = vector.extract_strided_slice %11 {offsets = [8, 0], sizes = [8, 128], strides = [1, 1]} : vector<64x128xf32> to vector<8x128xf32>
    %42 = arith.truncf %40 : vector<8x32xf32> to vector<8x32xbf16>
    %cst_23 = arith.constant dense<0.000000e+00> : vector<8x128xf32>
    %43 = tpu.matmul %42, %12, %cst_23 {dimension_numbers = #tpu.dot_dimension_numbers<[1], [0], [0], [1], [0, 0, 1, 1], [], []>} : vector<8x32xbf16>, vector<32x128xbf16>, vector<8x128xf32> -> vector<8x128xf32>
    %44 = arith.addf %41, %43 : vector<8x128xf32>
    %45 = arith.negf %44 : vector<8x128xf32>
    %46 = math.exp %45 : vector<8x128xf32>
    %cst_24 = arith.constant 1.000000e+00 : f32
    %47 = vector.broadcast %cst_24 : f32 to vector<8x128xf32>
    %48 = arith.addf %47, %46 : vector<8x128xf32>
    %49 = arith.divf %47, %48 : vector<8x128xf32>
    %50 = math.tanh %44 : vector<8x128xf32>
    %51 = vector.extract_strided_slice %49 {offsets = [0, 0], sizes = [8, 32], strides = [1, 1]} : vector<8x128xf32> to vector<8x32xf32>
    %52 = vector.extract_strided_slice %49 {offsets = [0, 32], sizes = [8, 32], strides = [1, 1]} : vector<8x128xf32> to vector<8x32xf32>
    %53 = vector.extract_strided_slice %50 {offsets = [0, 64], sizes = [8, 32], strides = [1, 1]} : vector<8x128xf32> to vector<8x32xf32>
    %54 = vector.extract_strided_slice %49 {offsets = [0, 96], sizes = [8, 32], strides = [1, 1]} : vector<8x128xf32> to vector<8x32xf32>
    %55 = arith.mulf %52, %38 : vector<8x32xf32>
    %56 = arith.mulf %51, %53 : vector<8x32xf32>
    %57 = arith.addf %55, %56 : vector<8x32xf32>
    %58 = math.tanh %57 : vector<8x32xf32>
    %59 = arith.mulf %54, %58 : vector<8x32xf32>
    %60 = arith.truncf %40 : vector<8x32xf32> to vector<8x32xbf16>
    %cst_25 = arith.constant dense<0.000000e+00> : vector<8x128xf32>
    %61 = tpu.matmul %60, %14, %cst_25 {dimension_numbers = #tpu.dot_dimension_numbers<[1], [0], [0], [1], [0, 0, 1, 1], [], []>} : vector<8x32xbf16>, vector<32x128xbf16>, vector<8x128xf32> -> vector<8x128xf32>
    %62 = arith.truncf %19 : vector<8x32xf32> to vector<8x32xbf16>
    %cst_26 = arith.constant dense<0.000000e+00> : vector<8x128xf32>
    %63 = tpu.matmul %62, %13, %cst_26 {dimension_numbers = #tpu.dot_dimension_numbers<[1], [0], [0], [1], [0, 0, 1, 1], [], []>} : vector<8x32xbf16>, vector<32x128xbf16>, vector<8x128xf32> -> vector<8x128xf32>
    %64 = arith.addf %61, %63 : vector<8x128xf32>
    %65 = vector.broadcast %15 : vector<1x128xf32> to vector<8x128xf32>
    %66 = arith.addf %64, %65 : vector<8x128xf32>
    %67 = arith.negf %66 : vector<8x128xf32>
    %68 = math.exp %67 : vector<8x128xf32>
    %cst_27 = arith.constant 1.000000e+00 : f32
    %69 = vector.broadcast %cst_27 : f32 to vector<8x128xf32>
    %70 = arith.addf %69, %68 : vector<8x128xf32>
    %71 = arith.divf %69, %70 : vector<8x128xf32>
    %72 = math.tanh %66 : vector<8x128xf32>
    %73 = vector.extract_strided_slice %71 {offsets = [0, 0], sizes = [8, 32], strides = [1, 1]} : vector<8x128xf32> to vector<8x32xf32>
    %74 = vector.extract_strided_slice %71 {offsets = [0, 32], sizes = [8, 32], strides = [1, 1]} : vector<8x128xf32> to vector<8x32xf32>
    %75 = vector.extract_strided_slice %72 {offsets = [0, 64], sizes = [8, 32], strides = [1, 1]} : vector<8x128xf32> to vector<8x32xf32>
    %76 = vector.extract_strided_slice %71 {offsets = [0, 96], sizes = [8, 32], strides = [1, 1]} : vector<8x128xf32> to vector<8x32xf32>
    %77 = arith.mulf %74, %21 : vector<8x32xf32>
    %78 = arith.mulf %73, %75 : vector<8x32xf32>
    %79 = arith.addf %77, %78 : vector<8x32xf32>
    %80 = math.tanh %79 : vector<8x32xf32>
    %81 = arith.mulf %76, %80 : vector<8x32xf32>
    %82 = arith.truncf %81 : vector<8x32xf32> to vector<8x32xbf16>
    %cst_28 = arith.constant dense<0.000000e+00> : vector<8x128xf32>
    %83 = tpu.matmul %82, %16, %cst_28 {dimension_numbers = #tpu.dot_dimension_numbers<[1], [0], [0], [1], [0, 0, 1, 1], [], []>} : vector<8x32xbf16>, vector<32x128xbf16>, vector<8x128xf32> -> vector<8x128xf32>
    %84 = vector.broadcast %17 : vector<1x128xf32> to vector<8x128xf32>
    %85 = arith.addf %83, %84 : vector<8x128xf32>
    %c0_29 = arith.constant 0 : index
    %c0_30 = arith.constant 0 : index
    %86 = vector.load %arg9[%c0_29, %c0_30] : memref<64x128xf32, #tpu.memory_space<vmem>>, vector<8x128xf32>
    tpu.vector_store %arg9[%c0_29, %c0_30], %85 {strides = array<i32>} : memref<64x128xf32, #tpu.memory_space<vmem>>, vector<8x128xf32>,
    %87 = vector.extract_strided_slice %11 {offsets = [16, 0], sizes = [8, 128], strides = [1, 1]} : vector<64x128xf32> to vector<8x128xf32>
    %88 = arith.truncf %59 : vector<8x32xf32> to vector<8x32xbf16>
    %cst_31 = arith.constant dense<0.000000e+00> : vector<8x128xf32>
    %89 = tpu.matmul %88, %12, %cst_31 {dimension_numbers = #tpu.dot_dimension_numbers<[1], [0], [0], [1], [0, 0, 1, 1], [], []>} : vector<8x32xbf16>, vector<32x128xbf16>, vector<8x128xf32> -> vector<8x128xf32>
    %90 = arith.addf %87, %89 : vector<8x128xf32>
    %91 = arith.negf %90 : vector<8x128xf32>
    %92 = math.exp %91 : vector<8x128xf32>
    %cst_32 = arith.constant 1.000000e+00 : f32
    %93 = vector.broadcast %cst_32 : f32 to vector<8x128xf32>
    %94 = arith.addf %93, %92 : vector<8x128xf32>
    %95 = arith.divf %93, %94 : vector<8x128xf32>
    %96 = math.tanh %90 : vector<8x128xf32>
    %97 = vector.extract_strided_slice %95 {offsets = [0, 0], sizes = [8, 32], strides = [1, 1]} : vector<8x128xf32> to vector<8x32xf32>
    %98 = vector.extract_strided_slice %95 {offsets = [0, 32], sizes = [8, 32], strides = [1, 1]} : vector<8x128xf32> to vector<8x32xf32>
    %99 = vector.extract_strided_slice %96 {offsets = [0, 64], sizes = [8, 32], strides = [1, 1]} : vector<8x128xf32> to vector<8x32xf32>
    %100 = vector.extract_strided_slice %95 {offsets = [0, 96], sizes = [8, 32], strides = [1, 1]} : vector<8x128xf32> to vector<8x32xf32>
    %101 = arith.mulf %98, %57 : vector<8x32xf32>
    %102 = arith.mulf %97, %99 : vector<8x32xf32>
    %103 = arith.addf %101, %102 : vector<8x32xf32>
    %104 = math.tanh %103 : vector<8x32xf32>
    %105 = arith.mulf %100, %104 : vector<8x32xf32>
    %106 = arith.truncf %59 : vector<8x32xf32> to vector<8x32xbf16>
    %cst_33 = arith.constant dense<0.000000e+00> : vector<8x128xf32>
    %107 = tpu.matmul %106, %14, %cst_33 {dimension_numbers = #tpu.dot_dimension_numbers<[1], [0], [0], [1], [0, 0, 1, 1], [], []>} : vector<8x32xbf16>, vector<32x128xbf16>, vector<8x128xf32> -> vector<8x128xf32>
    %108 = arith.truncf %81 : vector<8x32xf32> to vector<8x32xbf16>
    %cst_34 = arith.constant dense<0.000000e+00> : vector<8x128xf32>
    %109 = tpu.matmul %108, %13, %cst_34 {dimension_numbers = #tpu.dot_dimension_numbers<[1], [0], [0], [1], [0, 0, 1, 1], [], []>} : vector<8x32xbf16>, vector<32x128xbf16>, vector<8x128xf32> -> vector<8x128xf32>
    %110 = arith.addf %107, %109 : vector<8x128xf32>
    %111 = vector.broadcast %15 : vector<1x128xf32> to vector<8x128xf32>
    %112 = arith.addf %110, %111 : vector<8x128xf32>
    %113 = arith.negf %112 : vector<8x128xf32>
    %114 = math.exp %113 : vector<8x128xf32>
    %cst_35 = arith.constant 1.000000e+00 : f32
    %115 = vector.broadcast %cst_35 : f32 to vector<8x128xf32>
    %116 = arith.addf %115, %114 : vector<8x128xf32>
    %117 = arith.divf %115, %116 : vector<8x128xf32>
    %118 = math.tanh %112 : vector<8x128xf32>
    %119 = vector.extract_strided_slice %117 {offsets = [0, 0], sizes = [8, 32], strides = [1, 1]} : vector<8x128xf32> to vector<8x32xf32>
    %120 = vector.extract_strided_slice %117 {offsets = [0, 32], sizes = [8, 32], strides = [1, 1]} : vector<8x128xf32> to vector<8x32xf32>
    %121 = vector.extract_strided_slice %118 {offsets = [0, 64], sizes = [8, 32], strides = [1, 1]} : vector<8x128xf32> to vector<8x32xf32>
    %122 = vector.extract_strided_slice %117 {offsets = [0, 96], sizes = [8, 32], strides = [1, 1]} : vector<8x128xf32> to vector<8x32xf32>
    %123 = arith.mulf %120, %79 : vector<8x32xf32>
    %124 = arith.mulf %119, %121 : vector<8x32xf32>
    %125 = arith.addf %123, %124 : vector<8x32xf32>
    %126 = math.tanh %125 : vector<8x32xf32>
    %127 = arith.mulf %122, %126 : vector<8x32xf32>
    %128 = arith.truncf %127 : vector<8x32xf32> to vector<8x32xbf16>
    %cst_36 = arith.constant dense<0.000000e+00> : vector<8x128xf32>
    %129 = tpu.matmul %128, %16, %cst_36 {dimension_numbers = #tpu.dot_dimension_numbers<[1], [0], [0], [1], [0, 0, 1, 1], [], []>} : vector<8x32xbf16>, vector<32x128xbf16>, vector<8x128xf32> -> vector<8x128xf32>
    %130 = vector.broadcast %17 : vector<1x128xf32> to vector<8x128xf32>
    %131 = arith.addf %129, %130 : vector<8x128xf32>
    %c8 = arith.constant 8 : index
    %c0_37 = arith.constant 0 : index
    %132 = vector.load %arg9[%c8, %c0_37] : memref<64x128xf32, #tpu.memory_space<vmem>>, vector<8x128xf32>
    tpu.vector_store %arg9[%c8, %c0_37], %131 {strides = array<i32>} : memref<64x128xf32, #tpu.memory_space<vmem>>, vector<8x128xf32>,
    %133 = vector.extract_strided_slice %11 {offsets = [24, 0], sizes = [8, 128], strides = [1, 1]} : vector<64x128xf32> to vector<8x128xf32>
    %134 = arith.truncf %105 : vector<8x32xf32> to vector<8x32xbf16>
    %cst_38 = arith.constant dense<0.000000e+00> : vector<8x128xf32>
    %135 = tpu.matmul %134, %12, %cst_38 {dimension_numbers = #tpu.dot_dimension_numbers<[1], [0], [0], [1], [0, 0, 1, 1], [], []>} : vector<8x32xbf16>, vector<32x128xbf16>, vector<8x128xf32> -> vector<8x128xf32>
    %136 = arith.addf %133, %135 : vector<8x128xf32>
    %137 = arith.negf %136 : vector<8x128xf32>
    %138 = math.exp %137 : vector<8x128xf32>
    %cst_39 = arith.constant 1.000000e+00 : f32
    %139 = vector.broadcast %cst_39 : f32 to vector<8x128xf32>
    %140 = arith.addf %139, %138 : vector<8x128xf32>
    %141 = arith.divf %139, %140 : vector<8x128xf32>
    %142 = math.tanh %136 : vector<8x128xf32>
    %143 = vector.extract_strided_slice %141 {offsets = [0, 0], sizes = [8, 32], strides = [1, 1]} : vector<8x128xf32> to vector<8x32xf32>
    %144 = vector.extract_strided_slice %141 {offsets = [0, 32], sizes = [8, 32], strides = [1, 1]} : vector<8x128xf32> to vector<8x32xf32>
    %145 = vector.extract_strided_slice %142 {offsets = [0, 64], sizes = [8, 32], strides = [1, 1]} : vector<8x128xf32> to vector<8x32xf32>
    %146 = vector.extract_strided_slice %141 {offsets = [0, 96], sizes = [8, 32], strides = [1, 1]} : vector<8x128xf32> to vector<8x32xf32>
    %147 = arith.mulf %144, %103 : vector<8x32xf32>
    %148 = arith.mulf %143, %145 : vector<8x32xf32>
    %149 = arith.addf %147, %148 : vector<8x32xf32>
    %150 = math.tanh %149 : vector<8x32xf32>
    %151 = arith.mulf %146, %150 : vector<8x32xf32>
    %152 = arith.truncf %105 : vector<8x32xf32> to vector<8x32xbf16>
    %cst_40 = arith.constant dense<0.000000e+00> : vector<8x128xf32>
    %153 = tpu.matmul %152, %14, %cst_40 {dimension_numbers = #tpu.dot_dimension_numbers<[1], [0], [0], [1], [0, 0, 1, 1], [], []>} : vector<8x32xbf16>, vector<32x128xbf16>, vector<8x128xf32> -> vector<8x128xf32>
    %154 = arith.truncf %127 : vector<8x32xf32> to vector<8x32xbf16>
    %cst_41 = arith.constant dense<0.000000e+00> : vector<8x128xf32>
    %155 = tpu.matmul %154, %13, %cst_41 {dimension_numbers = #tpu.dot_dimension_numbers<[1], [0], [0], [1], [0, 0, 1, 1], [], []>} : vector<8x32xbf16>, vector<32x128xbf16>, vector<8x128xf32> -> vector<8x128xf32>
    %156 = arith.addf %153, %155 : vector<8x128xf32>
    %157 = vector.broadcast %15 : vector<1x128xf32> to vector<8x128xf32>
    %158 = arith.addf %156, %157 : vector<8x128xf32>
    %159 = arith.negf %158 : vector<8x128xf32>
    %160 = math.exp %159 : vector<8x128xf32>
    %cst_42 = arith.constant 1.000000e+00 : f32
    %161 = vector.broadcast %cst_42 : f32 to vector<8x128xf32>
    %162 = arith.addf %161, %160 : vector<8x128xf32>
    %163 = arith.divf %161, %162 : vector<8x128xf32>
    %164 = math.tanh %158 : vector<8x128xf32>
    %165 = vector.extract_strided_slice %163 {offsets = [0, 0], sizes = [8, 32], strides = [1, 1]} : vector<8x128xf32> to vector<8x32xf32>
    %166 = vector.extract_strided_slice %163 {offsets = [0, 32], sizes = [8, 32], strides = [1, 1]} : vector<8x128xf32> to vector<8x32xf32>
    %167 = vector.extract_strided_slice %164 {offsets = [0, 64], sizes = [8, 32], strides = [1, 1]} : vector<8x128xf32> to vector<8x32xf32>
    %168 = vector.extract_strided_slice %163 {offsets = [0, 96], sizes = [8, 32], strides = [1, 1]} : vector<8x128xf32> to vector<8x32xf32>
    %169 = arith.mulf %166, %125 : vector<8x32xf32>
    %170 = arith.mulf %165, %167 : vector<8x32xf32>
    %171 = arith.addf %169, %170 : vector<8x32xf32>
    %172 = math.tanh %171 : vector<8x32xf32>
    %173 = arith.mulf %168, %172 : vector<8x32xf32>
    %174 = arith.truncf %173 : vector<8x32xf32> to vector<8x32xbf16>
    %cst_43 = arith.constant dense<0.000000e+00> : vector<8x128xf32>
    %175 = tpu.matmul %174, %16, %cst_43 {dimension_numbers = #tpu.dot_dimension_numbers<[1], [0], [0], [1], [0, 0, 1, 1], [], []>} : vector<8x32xbf16>, vector<32x128xbf16>, vector<8x128xf32> -> vector<8x128xf32>
    %176 = vector.broadcast %17 : vector<1x128xf32> to vector<8x128xf32>
    %177 = arith.addf %175, %176 : vector<8x128xf32>
    %c16 = arith.constant 16 : index
    %c0_44 = arith.constant 0 : index
    %178 = vector.load %arg9[%c16, %c0_44] : memref<64x128xf32, #tpu.memory_space<vmem>>, vector<8x128xf32>
    tpu.vector_store %arg9[%c16, %c0_44], %177 {strides = array<i32>} : memref<64x128xf32, #tpu.memory_space<vmem>>, vector<8x128xf32>,
    %179 = vector.extract_strided_slice %11 {offsets = [32, 0], sizes = [8, 128], strides = [1, 1]} : vector<64x128xf32> to vector<8x128xf32>
    %180 = arith.truncf %151 : vector<8x32xf32> to vector<8x32xbf16>
    %cst_45 = arith.constant dense<0.000000e+00> : vector<8x128xf32>
    %181 = tpu.matmul %180, %12, %cst_45 {dimension_numbers = #tpu.dot_dimension_numbers<[1], [0], [0], [1], [0, 0, 1, 1], [], []>} : vector<8x32xbf16>, vector<32x128xbf16>, vector<8x128xf32> -> vector<8x128xf32>
    %182 = arith.addf %179, %181 : vector<8x128xf32>
    %183 = arith.negf %182 : vector<8x128xf32>
    %184 = math.exp %183 : vector<8x128xf32>
    %cst_46 = arith.constant 1.000000e+00 : f32
    %185 = vector.broadcast %cst_46 : f32 to vector<8x128xf32>
    %186 = arith.addf %185, %184 : vector<8x128xf32>
    %187 = arith.divf %185, %186 : vector<8x128xf32>
    %188 = math.tanh %182 : vector<8x128xf32>
    %189 = vector.extract_strided_slice %187 {offsets = [0, 0], sizes = [8, 32], strides = [1, 1]} : vector<8x128xf32> to vector<8x32xf32>
    %190 = vector.extract_strided_slice %187 {offsets = [0, 32], sizes = [8, 32], strides = [1, 1]} : vector<8x128xf32> to vector<8x32xf32>
    %191 = vector.extract_strided_slice %188 {offsets = [0, 64], sizes = [8, 32], strides = [1, 1]} : vector<8x128xf32> to vector<8x32xf32>
    %192 = vector.extract_strided_slice %187 {offsets = [0, 96], sizes = [8, 32], strides = [1, 1]} : vector<8x128xf32> to vector<8x32xf32>
    %193 = arith.mulf %190, %149 : vector<8x32xf32>
    %194 = arith.mulf %189, %191 : vector<8x32xf32>
    %195 = arith.addf %193, %194 : vector<8x32xf32>
    %196 = math.tanh %195 : vector<8x32xf32>
    %197 = arith.mulf %192, %196 : vector<8x32xf32>
    %198 = arith.truncf %151 : vector<8x32xf32> to vector<8x32xbf16>
    %cst_47 = arith.constant dense<0.000000e+00> : vector<8x128xf32>
    %199 = tpu.matmul %198, %14, %cst_47 {dimension_numbers = #tpu.dot_dimension_numbers<[1], [0], [0], [1], [0, 0, 1, 1], [], []>} : vector<8x32xbf16>, vector<32x128xbf16>, vector<8x128xf32> -> vector<8x128xf32>
    %200 = arith.truncf %173 : vector<8x32xf32> to vector<8x32xbf16>
    %cst_48 = arith.constant dense<0.000000e+00> : vector<8x128xf32>
    %201 = tpu.matmul %200, %13, %cst_48 {dimension_numbers = #tpu.dot_dimension_numbers<[1], [0], [0], [1], [0, 0, 1, 1], [], []>} : vector<8x32xbf16>, vector<32x128xbf16>, vector<8x128xf32> -> vector<8x128xf32>
    %202 = arith.addf %199, %201 : vector<8x128xf32>
    %203 = vector.broadcast %15 : vector<1x128xf32> to vector<8x128xf32>
    %204 = arith.addf %202, %203 : vector<8x128xf32>
    %205 = arith.negf %204 : vector<8x128xf32>
    %206 = math.exp %205 : vector<8x128xf32>
    %cst_49 = arith.constant 1.000000e+00 : f32
    %207 = vector.broadcast %cst_49 : f32 to vector<8x128xf32>
    %208 = arith.addf %207, %206 : vector<8x128xf32>
    %209 = arith.divf %207, %208 : vector<8x128xf32>
    %210 = math.tanh %204 : vector<8x128xf32>
    %211 = vector.extract_strided_slice %209 {offsets = [0, 0], sizes = [8, 32], strides = [1, 1]} : vector<8x128xf32> to vector<8x32xf32>
    %212 = vector.extract_strided_slice %209 {offsets = [0, 32], sizes = [8, 32], strides = [1, 1]} : vector<8x128xf32> to vector<8x32xf32>
    %213 = vector.extract_strided_slice %210 {offsets = [0, 64], sizes = [8, 32], strides = [1, 1]} : vector<8x128xf32> to vector<8x32xf32>
    %214 = vector.extract_strided_slice %209 {offsets = [0, 96], sizes = [8, 32], strides = [1, 1]} : vector<8x128xf32> to vector<8x32xf32>
    %215 = arith.mulf %212, %171 : vector<8x32xf32>
    %216 = arith.mulf %211, %213 : vector<8x32xf32>
    %217 = arith.addf %215, %216 : vector<8x32xf32>
    %218 = math.tanh %217 : vector<8x32xf32>
    %219 = arith.mulf %214, %218 : vector<8x32xf32>
    %220 = arith.truncf %219 : vector<8x32xf32> to vector<8x32xbf16>
    %cst_50 = arith.constant dense<0.000000e+00> : vector<8x128xf32>
    %221 = tpu.matmul %220, %16, %cst_50 {dimension_numbers = #tpu.dot_dimension_numbers<[1], [0], [0], [1], [0, 0, 1, 1], [], []>} : vector<8x32xbf16>, vector<32x128xbf16>, vector<8x128xf32> -> vector<8x128xf32>
    %222 = vector.broadcast %17 : vector<1x128xf32> to vector<8x128xf32>
    %223 = arith.addf %221, %222 : vector<8x128xf32>
    %c24 = arith.constant 24 : index
    %c0_51 = arith.constant 0 : index
    %224 = vector.load %arg9[%c24, %c0_51] : memref<64x128xf32, #tpu.memory_space<vmem>>, vector<8x128xf32>
    tpu.vector_store %arg9[%c24, %c0_51], %223 {strides = array<i32>} : memref<64x128xf32, #tpu.memory_space<vmem>>, vector<8x128xf32>,
    %225 = vector.extract_strided_slice %11 {offsets = [40, 0], sizes = [8, 128], strides = [1, 1]} : vector<64x128xf32> to vector<8x128xf32>
    %226 = arith.truncf %197 : vector<8x32xf32> to vector<8x32xbf16>
    %cst_52 = arith.constant dense<0.000000e+00> : vector<8x128xf32>
    %227 = tpu.matmul %226, %12, %cst_52 {dimension_numbers = #tpu.dot_dimension_numbers<[1], [0], [0], [1], [0, 0, 1, 1], [], []>} : vector<8x32xbf16>, vector<32x128xbf16>, vector<8x128xf32> -> vector<8x128xf32>
    %228 = arith.addf %225, %227 : vector<8x128xf32>
    %229 = arith.negf %228 : vector<8x128xf32>
    %230 = math.exp %229 : vector<8x128xf32>
    %cst_53 = arith.constant 1.000000e+00 : f32
    %231 = vector.broadcast %cst_53 : f32 to vector<8x128xf32>
    %232 = arith.addf %231, %230 : vector<8x128xf32>
    %233 = arith.divf %231, %232 : vector<8x128xf32>
    %234 = math.tanh %228 : vector<8x128xf32>
    %235 = vector.extract_strided_slice %233 {offsets = [0, 0], sizes = [8, 32], strides = [1, 1]} : vector<8x128xf32> to vector<8x32xf32>
    %236 = vector.extract_strided_slice %233 {offsets = [0, 32], sizes = [8, 32], strides = [1, 1]} : vector<8x128xf32> to vector<8x32xf32>
    %237 = vector.extract_strided_slice %234 {offsets = [0, 64], sizes = [8, 32], strides = [1, 1]} : vector<8x128xf32> to vector<8x32xf32>
    %238 = vector.extract_strided_slice %233 {offsets = [0, 96], sizes = [8, 32], strides = [1, 1]} : vector<8x128xf32> to vector<8x32xf32>
    %239 = arith.mulf %236, %195 : vector<8x32xf32>
    %240 = arith.mulf %235, %237 : vector<8x32xf32>
    %241 = arith.addf %239, %240 : vector<8x32xf32>
    %242 = math.tanh %241 : vector<8x32xf32>
    %243 = arith.mulf %238, %242 : vector<8x32xf32>
    %244 = arith.truncf %197 : vector<8x32xf32> to vector<8x32xbf16>
    %cst_54 = arith.constant dense<0.000000e+00> : vector<8x128xf32>
    %245 = tpu.matmul %244, %14, %cst_54 {dimension_numbers = #tpu.dot_dimension_numbers<[1], [0], [0], [1], [0, 0, 1, 1], [], []>} : vector<8x32xbf16>, vector<32x128xbf16>, vector<8x128xf32> -> vector<8x128xf32>
    %246 = arith.truncf %219 : vector<8x32xf32> to vector<8x32xbf16>
    %cst_55 = arith.constant dense<0.000000e+00> : vector<8x128xf32>
    %247 = tpu.matmul %246, %13, %cst_55 {dimension_numbers = #tpu.dot_dimension_numbers<[1], [0], [0], [1], [0, 0, 1, 1], [], []>} : vector<8x32xbf16>, vector<32x128xbf16>, vector<8x128xf32> -> vector<8x128xf32>
    %248 = arith.addf %245, %247 : vector<8x128xf32>
    %249 = vector.broadcast %15 : vector<1x128xf32> to vector<8x128xf32>
    %250 = arith.addf %248, %249 : vector<8x128xf32>
    %251 = arith.negf %250 : vector<8x128xf32>
    %252 = math.exp %251 : vector<8x128xf32>
    %cst_56 = arith.constant 1.000000e+00 : f32
    %253 = vector.broadcast %cst_56 : f32 to vector<8x128xf32>
    %254 = arith.addf %253, %252 : vector<8x128xf32>
    %255 = arith.divf %253, %254 : vector<8x128xf32>
    %256 = math.tanh %250 : vector<8x128xf32>
    %257 = vector.extract_strided_slice %255 {offsets = [0, 0], sizes = [8, 32], strides = [1, 1]} : vector<8x128xf32> to vector<8x32xf32>
    %258 = vector.extract_strided_slice %255 {offsets = [0, 32], sizes = [8, 32], strides = [1, 1]} : vector<8x128xf32> to vector<8x32xf32>
    %259 = vector.extract_strided_slice %256 {offsets = [0, 64], sizes = [8, 32], strides = [1, 1]} : vector<8x128xf32> to vector<8x32xf32>
    %260 = vector.extract_strided_slice %255 {offsets = [0, 96], sizes = [8, 32], strides = [1, 1]} : vector<8x128xf32> to vector<8x32xf32>
    %261 = arith.mulf %258, %217 : vector<8x32xf32>
    %262 = arith.mulf %257, %259 : vector<8x32xf32>
    %263 = arith.addf %261, %262 : vector<8x32xf32>
    %264 = math.tanh %263 : vector<8x32xf32>
    %265 = arith.mulf %260, %264 : vector<8x32xf32>
    %266 = arith.truncf %265 : vector<8x32xf32> to vector<8x32xbf16>
    %cst_57 = arith.constant dense<0.000000e+00> : vector<8x128xf32>
    %267 = tpu.matmul %266, %16, %cst_57 {dimension_numbers = #tpu.dot_dimension_numbers<[1], [0], [0], [1], [0, 0, 1, 1], [], []>} : vector<8x32xbf16>, vector<32x128xbf16>, vector<8x128xf32> -> vector<8x128xf32>
    %268 = vector.broadcast %17 : vector<1x128xf32> to vector<8x128xf32>
    %269 = arith.addf %267, %268 : vector<8x128xf32>
    %c32 = arith.constant 32 : index
    %c0_58 = arith.constant 0 : index
    %270 = vector.load %arg9[%c32, %c0_58] : memref<64x128xf32, #tpu.memory_space<vmem>>, vector<8x128xf32>
    tpu.vector_store %arg9[%c32, %c0_58], %269 {strides = array<i32>} : memref<64x128xf32, #tpu.memory_space<vmem>>, vector<8x128xf32>,
    %271 = vector.extract_strided_slice %11 {offsets = [48, 0], sizes = [8, 128], strides = [1, 1]} : vector<64x128xf32> to vector<8x128xf32>
    %272 = arith.truncf %243 : vector<8x32xf32> to vector<8x32xbf16>
    %cst_59 = arith.constant dense<0.000000e+00> : vector<8x128xf32>
    %273 = tpu.matmul %272, %12, %cst_59 {dimension_numbers = #tpu.dot_dimension_numbers<[1], [0], [0], [1], [0, 0, 1, 1], [], []>} : vector<8x32xbf16>, vector<32x128xbf16>, vector<8x128xf32> -> vector<8x128xf32>
    %274 = arith.addf %271, %273 : vector<8x128xf32>
    %275 = arith.negf %274 : vector<8x128xf32>
    %276 = math.exp %275 : vector<8x128xf32>
    %cst_60 = arith.constant 1.000000e+00 : f32
    %277 = vector.broadcast %cst_60 : f32 to vector<8x128xf32>
    %278 = arith.addf %277, %276 : vector<8x128xf32>
    %279 = arith.divf %277, %278 : vector<8x128xf32>
    %280 = math.tanh %274 : vector<8x128xf32>
    %281 = vector.extract_strided_slice %279 {offsets = [0, 0], sizes = [8, 32], strides = [1, 1]} : vector<8x128xf32> to vector<8x32xf32>
    %282 = vector.extract_strided_slice %279 {offsets = [0, 32], sizes = [8, 32], strides = [1, 1]} : vector<8x128xf32> to vector<8x32xf32>
    %283 = vector.extract_strided_slice %280 {offsets = [0, 64], sizes = [8, 32], strides = [1, 1]} : vector<8x128xf32> to vector<8x32xf32>
    %284 = vector.extract_strided_slice %279 {offsets = [0, 96], sizes = [8, 32], strides = [1, 1]} : vector<8x128xf32> to vector<8x32xf32>
    %285 = arith.mulf %282, %241 : vector<8x32xf32>
    %286 = arith.mulf %281, %283 : vector<8x32xf32>
    %287 = arith.addf %285, %286 : vector<8x32xf32>
    %288 = math.tanh %287 : vector<8x32xf32>
    %289 = arith.mulf %284, %288 : vector<8x32xf32>
    %290 = arith.truncf %243 : vector<8x32xf32> to vector<8x32xbf16>
    %cst_61 = arith.constant dense<0.000000e+00> : vector<8x128xf32>
    %291 = tpu.matmul %290, %14, %cst_61 {dimension_numbers = #tpu.dot_dimension_numbers<[1], [0], [0], [1], [0, 0, 1, 1], [], []>} : vector<8x32xbf16>, vector<32x128xbf16>, vector<8x128xf32> -> vector<8x128xf32>
    %292 = arith.truncf %265 : vector<8x32xf32> to vector<8x32xbf16>
    %cst_62 = arith.constant dense<0.000000e+00> : vector<8x128xf32>
    %293 = tpu.matmul %292, %13, %cst_62 {dimension_numbers = #tpu.dot_dimension_numbers<[1], [0], [0], [1], [0, 0, 1, 1], [], []>} : vector<8x32xbf16>, vector<32x128xbf16>, vector<8x128xf32> -> vector<8x128xf32>
    %294 = arith.addf %291, %293 : vector<8x128xf32>
    %295 = vector.broadcast %15 : vector<1x128xf32> to vector<8x128xf32>
    %296 = arith.addf %294, %295 : vector<8x128xf32>
    %297 = arith.negf %296 : vector<8x128xf32>
    %298 = math.exp %297 : vector<8x128xf32>
    %cst_63 = arith.constant 1.000000e+00 : f32
    %299 = vector.broadcast %cst_63 : f32 to vector<8x128xf32>
    %300 = arith.addf %299, %298 : vector<8x128xf32>
    %301 = arith.divf %299, %300 : vector<8x128xf32>
    %302 = math.tanh %296 : vector<8x128xf32>
    %303 = vector.extract_strided_slice %301 {offsets = [0, 0], sizes = [8, 32], strides = [1, 1]} : vector<8x128xf32> to vector<8x32xf32>
    %304 = vector.extract_strided_slice %301 {offsets = [0, 32], sizes = [8, 32], strides = [1, 1]} : vector<8x128xf32> to vector<8x32xf32>
    %305 = vector.extract_strided_slice %302 {offsets = [0, 64], sizes = [8, 32], strides = [1, 1]} : vector<8x128xf32> to vector<8x32xf32>
    %306 = vector.extract_strided_slice %301 {offsets = [0, 96], sizes = [8, 32], strides = [1, 1]} : vector<8x128xf32> to vector<8x32xf32>
    %307 = arith.mulf %304, %263 : vector<8x32xf32>
    %308 = arith.mulf %303, %305 : vector<8x32xf32>
    %309 = arith.addf %307, %308 : vector<8x32xf32>
    %310 = math.tanh %309 : vector<8x32xf32>
    %311 = arith.mulf %306, %310 : vector<8x32xf32>
    %312 = arith.truncf %311 : vector<8x32xf32> to vector<8x32xbf16>
    %cst_64 = arith.constant dense<0.000000e+00> : vector<8x128xf32>
    %313 = tpu.matmul %312, %16, %cst_64 {dimension_numbers = #tpu.dot_dimension_numbers<[1], [0], [0], [1], [0, 0, 1, 1], [], []>} : vector<8x32xbf16>, vector<32x128xbf16>, vector<8x128xf32> -> vector<8x128xf32>
    %314 = vector.broadcast %17 : vector<1x128xf32> to vector<8x128xf32>
    %315 = arith.addf %313, %314 : vector<8x128xf32>
    %c40 = arith.constant 40 : index
    %c0_65 = arith.constant 0 : index
    %316 = vector.load %arg9[%c40, %c0_65] : memref<64x128xf32, #tpu.memory_space<vmem>>, vector<8x128xf32>
    tpu.vector_store %arg9[%c40, %c0_65], %315 {strides = array<i32>} : memref<64x128xf32, #tpu.memory_space<vmem>>, vector<8x128xf32>,
    %317 = vector.extract_strided_slice %11 {offsets = [56, 0], sizes = [8, 128], strides = [1, 1]} : vector<64x128xf32> to vector<8x128xf32>
    %318 = arith.truncf %289 : vector<8x32xf32> to vector<8x32xbf16>
    %cst_66 = arith.constant dense<0.000000e+00> : vector<8x128xf32>
    %319 = tpu.matmul %318, %12, %cst_66 {dimension_numbers = #tpu.dot_dimension_numbers<[1], [0], [0], [1], [0, 0, 1, 1], [], []>} : vector<8x32xbf16>, vector<32x128xbf16>, vector<8x128xf32> -> vector<8x128xf32>
    %320 = arith.addf %317, %319 : vector<8x128xf32>
    %321 = arith.negf %320 : vector<8x128xf32>
    %322 = math.exp %321 : vector<8x128xf32>
    %cst_67 = arith.constant 1.000000e+00 : f32
    %323 = vector.broadcast %cst_67 : f32 to vector<8x128xf32>
    %324 = arith.addf %323, %322 : vector<8x128xf32>
    %325 = arith.divf %323, %324 : vector<8x128xf32>
    %326 = math.tanh %320 : vector<8x128xf32>
    %327 = vector.extract_strided_slice %325 {offsets = [0, 0], sizes = [8, 32], strides = [1, 1]} : vector<8x128xf32> to vector<8x32xf32>
    %328 = vector.extract_strided_slice %325 {offsets = [0, 32], sizes = [8, 32], strides = [1, 1]} : vector<8x128xf32> to vector<8x32xf32>
    %329 = vector.extract_strided_slice %326 {offsets = [0, 64], sizes = [8, 32], strides = [1, 1]} : vector<8x128xf32> to vector<8x32xf32>
    %330 = vector.extract_strided_slice %325 {offsets = [0, 96], sizes = [8, 32], strides = [1, 1]} : vector<8x128xf32> to vector<8x32xf32>
    %331 = arith.mulf %328, %287 : vector<8x32xf32>
    %332 = arith.mulf %327, %329 : vector<8x32xf32>
    %333 = arith.addf %331, %332 : vector<8x32xf32>
    %334 = math.tanh %333 : vector<8x32xf32>
    %335 = arith.mulf %330, %334 : vector<8x32xf32>
    %336 = arith.truncf %289 : vector<8x32xf32> to vector<8x32xbf16>
    %cst_68 = arith.constant dense<0.000000e+00> : vector<8x128xf32>
    %337 = tpu.matmul %336, %14, %cst_68 {dimension_numbers = #tpu.dot_dimension_numbers<[1], [0], [0], [1], [0, 0, 1, 1], [], []>} : vector<8x32xbf16>, vector<32x128xbf16>, vector<8x128xf32> -> vector<8x128xf32>
    %338 = arith.truncf %311 : vector<8x32xf32> to vector<8x32xbf16>
    %cst_69 = arith.constant dense<0.000000e+00> : vector<8x128xf32>
    %339 = tpu.matmul %338, %13, %cst_69 {dimension_numbers = #tpu.dot_dimension_numbers<[1], [0], [0], [1], [0, 0, 1, 1], [], []>} : vector<8x32xbf16>, vector<32x128xbf16>, vector<8x128xf32> -> vector<8x128xf32>
    %340 = arith.addf %337, %339 : vector<8x128xf32>
    %341 = vector.broadcast %15 : vector<1x128xf32> to vector<8x128xf32>
    %342 = arith.addf %340, %341 : vector<8x128xf32>
    %343 = arith.negf %342 : vector<8x128xf32>
    %344 = math.exp %343 : vector<8x128xf32>
    %cst_70 = arith.constant 1.000000e+00 : f32
    %345 = vector.broadcast %cst_70 : f32 to vector<8x128xf32>
    %346 = arith.addf %345, %344 : vector<8x128xf32>
    %347 = arith.divf %345, %346 : vector<8x128xf32>
    %348 = math.tanh %342 : vector<8x128xf32>
    %349 = vector.extract_strided_slice %347 {offsets = [0, 0], sizes = [8, 32], strides = [1, 1]} : vector<8x128xf32> to vector<8x32xf32>
    %350 = vector.extract_strided_slice %347 {offsets = [0, 32], sizes = [8, 32], strides = [1, 1]} : vector<8x128xf32> to vector<8x32xf32>
    %351 = vector.extract_strided_slice %348 {offsets = [0, 64], sizes = [8, 32], strides = [1, 1]} : vector<8x128xf32> to vector<8x32xf32>
    %352 = vector.extract_strided_slice %347 {offsets = [0, 96], sizes = [8, 32], strides = [1, 1]} : vector<8x128xf32> to vector<8x32xf32>
    %353 = arith.mulf %350, %309 : vector<8x32xf32>
    %354 = arith.mulf %349, %351 : vector<8x32xf32>
    %355 = arith.addf %353, %354 : vector<8x32xf32>
    %356 = math.tanh %355 : vector<8x32xf32>
    %357 = arith.mulf %352, %356 : vector<8x32xf32>
    %358 = arith.truncf %357 : vector<8x32xf32> to vector<8x32xbf16>
    %cst_71 = arith.constant dense<0.000000e+00> : vector<8x128xf32>
    %359 = tpu.matmul %358, %16, %cst_71 {dimension_numbers = #tpu.dot_dimension_numbers<[1], [0], [0], [1], [0, 0, 1, 1], [], []>} : vector<8x32xbf16>, vector<32x128xbf16>, vector<8x128xf32> -> vector<8x128xf32>
    %360 = vector.broadcast %17 : vector<1x128xf32> to vector<8x128xf32>
    %361 = arith.addf %359, %360 : vector<8x128xf32>
    %c48 = arith.constant 48 : index
    %c0_72 = arith.constant 0 : index
    %362 = vector.load %arg9[%c48, %c0_72] : memref<64x128xf32, #tpu.memory_space<vmem>>, vector<8x128xf32>
    tpu.vector_store %arg9[%c48, %c0_72], %361 {strides = array<i32>} : memref<64x128xf32, #tpu.memory_space<vmem>>, vector<8x128xf32>,
    %363 = arith.truncf %335 : vector<8x32xf32> to vector<8x32xbf16>
    %cst_73 = arith.constant dense<0.000000e+00> : vector<8x128xf32>
    %364 = tpu.matmul %363, %14, %cst_73 {dimension_numbers = #tpu.dot_dimension_numbers<[1], [0], [0], [1], [0, 0, 1, 1], [], []>} : vector<8x32xbf16>, vector<32x128xbf16>, vector<8x128xf32> -> vector<8x128xf32>
    %365 = arith.truncf %357 : vector<8x32xf32> to vector<8x32xbf16>
    %cst_74 = arith.constant dense<0.000000e+00> : vector<8x128xf32>
    %366 = tpu.matmul %365, %13, %cst_74 {dimension_numbers = #tpu.dot_dimension_numbers<[1], [0], [0], [1], [0, 0, 1, 1], [], []>} : vector<8x32xbf16>, vector<32x128xbf16>, vector<8x128xf32> -> vector<8x128xf32>
    %367 = arith.addf %364, %366 : vector<8x128xf32>
    %368 = vector.broadcast %15 : vector<1x128xf32> to vector<8x128xf32>
    %369 = arith.addf %367, %368 : vector<8x128xf32>
    %370 = arith.negf %369 : vector<8x128xf32>
    %371 = math.exp %370 : vector<8x128xf32>
    %cst_75 = arith.constant 1.000000e+00 : f32
    %372 = vector.broadcast %cst_75 : f32 to vector<8x128xf32>
    %373 = arith.addf %372, %371 : vector<8x128xf32>
    %374 = arith.divf %372, %373 : vector<8x128xf32>
    %375 = math.tanh %369 : vector<8x128xf32>
    %376 = vector.extract_strided_slice %374 {offsets = [0, 0], sizes = [8, 32], strides = [1, 1]} : vector<8x128xf32> to vector<8x32xf32>
    %377 = vector.extract_strided_slice %374 {offsets = [0, 32], sizes = [8, 32], strides = [1, 1]} : vector<8x128xf32> to vector<8x32xf32>
    %378 = vector.extract_strided_slice %375 {offsets = [0, 64], sizes = [8, 32], strides = [1, 1]} : vector<8x128xf32> to vector<8x32xf32>
    %379 = vector.extract_strided_slice %374 {offsets = [0, 96], sizes = [8, 32], strides = [1, 1]} : vector<8x128xf32> to vector<8x32xf32>
    %380 = arith.mulf %377, %355 : vector<8x32xf32>
    %381 = arith.mulf %376, %378 : vector<8x32xf32>
    %382 = arith.addf %380, %381 : vector<8x32xf32>
    %383 = math.tanh %382 : vector<8x32xf32>
    %384 = arith.mulf %379, %383 : vector<8x32xf32>
    %385 = arith.truncf %384 : vector<8x32xf32> to vector<8x32xbf16>
    %cst_76 = arith.constant dense<0.000000e+00> : vector<8x128xf32>
    %386 = tpu.matmul %385, %16, %cst_76 {dimension_numbers = #tpu.dot_dimension_numbers<[1], [0], [0], [1], [0, 0, 1, 1], [], []>} : vector<8x32xbf16>, vector<32x128xbf16>, vector<8x128xf32> -> vector<8x128xf32>
    %387 = vector.broadcast %17 : vector<1x128xf32> to vector<8x128xf32>
    %388 = arith.addf %386, %387 : vector<8x128xf32>
    %c56 = arith.constant 56 : index
    %c0_77 = arith.constant 0 : index
    %389 = vector.load %arg9[%c56, %c0_77] : memref<64x128xf32, #tpu.memory_space<vmem>>, vector<8x128xf32>
    tpu.vector_store %arg9[%c56, %c0_77], %388 {strides = array<i32>} : memref<64x128xf32, #tpu.memory_space<vmem>>, vector<8x128xf32>,
    return
  }
}

</mosaic_0001>

<bundles_post_ra>
// kernel: tpu_custom_call.1
= control target key start
LH: loop header
LB: loop body
LE: loop exit
PB: predicated region body
PF: predicated region fallthrough
CT: control target
= control target key end

     0   :  { %14 = vsyncpa [#allocation3], 0  ;;  %s3517_s0 = inlined_call_operand.vmem [shape: s32[64,1], index: 0, kind: input, shape index: {}]   ;;  %s3518_s1 = inlined_call_operand.vmem [shape: bf16[128,128], index: 1, kind: input, shape index: {}]   ;;  %s3519_s2 = inlined_call_operand.hbm [shape: bf16[32,128], index: 2, kind: input, shape index: {}]   ;;  %s3520_s3 = inlined_call_operand.vmem [shape: f32[1,128], index: 3, kind: input, shape index: {}]   ;;  %s3521_s4 = inlined_call_operand.hbm [shape: bf16[32,128], index: 4, kind: input, shape index: {}]   ;;  %s3522_s5 = inlined_call_operand.hbm [shape: bf16[32,128], index: 5, kind: input, shape index: {}]   ;;  %s3523_s6 = inlined_call_operand.vmem [shape: f32[1,128], index: 6, kind: input, shape index: {}]   ;;  %s3524_s7 = inlined_call_operand.hbm [shape: bf16[32,128], index: 7, kind: input, shape index: {}]   ;;  %s3525_s8 = inlined_call_operand.vmem [shape: f32[1,128], index: 8, kind: input, shape index: {}]   ;;  %s3526_s9 = inlined_call_operand.hbm [shape: f32[64,128], index: 9, kind: output, shape index: {}]  }
   0x1   :  { %15 = vsyncpa [#allocation6], 0 }
   0x2   :  { %16 = vsyncpa [#allocation9], 0 }
   0x3   :  { %17 = vsyncpa [#allocation4], 0  ;;  %s2936_s30 = smov [#allocation5]   ;;  %s2937_s11 = smov [#allocation2]  }
   0x4   :  { %s41_s10 = sshll.u32 %s2936_s30, 4  ;;  %s27_s12 = sshll.u32 %s2937_s11, 4  ;;  %s42_s10 = int_to_ptr.vmem [resolvable:$true] %s41_s10  ;;  %s28_s12 = int_to_ptr.vmem [resolvable:$true] %s27_s12 }
   0x5   :  { %s2836_s13 = scalar_lea.vmem %s42_s10, 256  ;;  %p2841_p1 = scmp.lt.s32.totalorder %s42_s10, %s42_s10 }
   0x6   :  { %p2837_p0 = scmp.ne.s32.totalorder %s42_s10, %s2836_s13  ;;  %p2842_p2 = scmp.lt.s32.totalorder %s2836_s13, %s2836_s13 }
   0x8   :  { %p2843_p3 = por %p2842_p2, %p2841_p1 }
   0xa   :  { %p2844_p4 = pnand %p2843_p3, %p2837_p0 }
   0xc   :  { %2847 = shalt.err (!%p2844_p4)
}
   0xd   :  { %s2938_s14 = smov 64   ;;  %s2939_s15 = smov 4  }
   0xe   :  { %47 = dma.hbm_to_vmem [thread:$0]  %s3521_s4, 256, %s42_s10, [#allocation6], %s2938_s14, %s2938_s14, %s2939_s15  }
   0xf   :  { %s2856_s18 = scalar_lea.vmem %s28_s12, 256  ;;  %p2861_p6 = scmp.lt.s32.totalorder %s28_s12, %s28_s12 }
  0x10   :  { %p2857_p5 = scmp.ne.s32.totalorder %s28_s12, %s2856_s18  ;;  %p2862_p7 = scmp.lt.s32.totalorder %s2856_s18, %s2856_s18 }
  0x12   :  { %p2863_p8 = por %p2862_p7, %p2861_p6 }
  0x14   :  { %p2864_p9 = pnand %p2863_p8, %p2857_p5 }
  0x16   :  { %2867 = shalt.err (!%p2864_p9)
}
  0x17   :  { %33 = dma.hbm_to_vmem [thread:$0]  %s3519_s2, 256, %s28_s12, [#allocation3], %s2938_s14, %s2938_s14, %s2939_s15  }
  0x18   :  { %s2940_s21 = smov [#allocation7]   ;;  %s2941_s23 = smov [#allocation8]  }
  0x19   :  { %s53_s22 = sshll.u32 %s2940_s21, 4  ;;  %s67_s24 = sshll.u32 %s2941_s23, 4  ;;  %s54_s22 = int_to_ptr.vmem [resolvable:$true] %s53_s22  ;;  %s68_s24 = int_to_ptr.vmem [resolvable:$true] %s67_s24 }
  0x1a   :  { %s2876_s4 = scalar_lea.vmem %s54_s22, 256  ;;  %p2881_p11 = scmp.lt.s32.totalorder %s54_s22, %s54_s22 }
  0x1b   :  { %p2877_p10 = scmp.ne.s32.totalorder %s54_s22, %s2876_s4  ;;  %p2882_p12 = scmp.lt.s32.totalorder %s2876_s4, %s2876_s4 }
  0x1d   :  { %p2883_p13 = por %p2882_p12, %p2881_p11 }
  0x1f   :  { %p2884_p0 = pnand %p2883_p13, %p2877_p10 }
  0x21   :  { %2887 = shalt.err (!%p2884_p0)
}
  0x22   :  { %59 = dma.hbm_to_vmem [thread:$0]  %s3522_s5, 256, %s54_s22, [#allocation6], %s2938_s14, %s2938_s14, %s2939_s15  }
  0x23   :  { %s2896_s2 = scalar_lea.vmem %s68_s24, 256  ;;  %p2901_p2 = scmp.lt.s32.totalorder %s68_s24, %s68_s24 }
  0x24   :  { %p2897_p1 = scmp.ne.s32.totalorder %s68_s24, %s2896_s2  ;;  %p2902_p3 = scmp.lt.s32.totalorder %s2896_s2, %s2896_s2 }
  0x26   :  { %p2903_p4 = por %p2902_p3, %p2901_p2 }
  0x28   :  { %p2904_p5 = pnand %p2903_p4, %p2897_p1 }
  0x2a   :  { %2907 = shalt.err (!%p2904_p5)
}
  0x2b   :  { %73 = dma.hbm_to_vmem [thread:$0]  %s3524_s7, 256, %s68_s24, [#allocation9], %s2938_s14, %s2938_s14, %s2939_s15  }
  0x2c   :  { %2928 = dma.done.wait [#allocation3], 256  }
  0x2d   :  { %2929 = vsyncadd [#allocation3], 4294967040 }
  0x2e   :  { %2930 = dma.done.wait [#allocation6], 512  }
  0x2f   :  { %2931 = vsyncadd [#allocation6], 4294966784 }
  0x30   :  { %2932 = dma.done.wait [#allocation9], 256  }
  0x31   :  { %2933 = vsyncadd [#allocation9], 4294967040  ;;  %v2942_v0 = vmov 0   ;;  %v2943_v1 = vmov 0.0   ;;  %v91_v2 = vld [vmem:[%s3517_s0 + $0x10] sm:$0xff]  ;;  %v89_v3 = vld [vmem:[%s3517_s0] sm:$0xff]  ;;  %v97_v16 = vlaneseq }
  0x32   :  { %2672 = vset.pattern.permute.xlu1 %v2942_v0  ;;  %2671 = vset.pattern.permute.xlu0 %v2942_v0  ;;  %v92_v4 = vld [vmem:[%s3517_s0 + $0x18] sm:$0xff]  ;;  %v90_v5 = vld [vmem:[%s3517_s0 + $0x8] sm:$0xff]  ;;  %vm2944_vm0 = vmmov 0   ;;  %v2674_v7 = vld [vmem:[%s3518_s1 + $0x30] sm:$0xff]   ;;  %v2945_v22 = vmov 1.0|1.0  }
  0x33   :  { %2401 = vmatprep.subr.bf16.mxu1 %v2943_v1  ;;  %106 = vperm.xlu1 %2672, %v91_v2   ;;  %v2673_v6 = vld [vmem:[%s3518_s1 + $0x38] sm:$0xff]   ;;  %v2675_v8 = vld [vmem:[%s3518_s1 + $0x28] sm:$0xff]   ;;  %v3053_v10 = vld [vmem:[#allocation2] sm:$0xff]   ;;  %v3081_v19 = vand.u32 127, %v97_v16  ;;  %s2946_s29 = smov 32   ;;  %vm317_vm7 = vcmask 261120  }
  0x34   :  { %100 = vperm.xlu0 %2671, %v89_v3   ;;  %2405 = vmatprep.mubr.msk.bf16.mxu1 %vm2944_vm0, %v2943_v1  ;;  %v3050_v9 = vld [vmem:[#allocation2 + $0x8] sm:$0xff]   ;;  %v2676_v11 = vld [vmem:[%s3518_s1 + $0x20] sm:$0xff]   ;;  %v2677_v12 = vld [vmem:[%s3518_s1 + $0x18] sm:$0xff]  }
  0x35   :  { %2377 = vmatprep.subr.bf16.mxu0 %v2673_v6  ;;  %2402 = vmatpush3.bf16.msra.mxu1 %v3050_v9  ;;  %v2678_v13 = vld [vmem:[%s3518_s1 + $0x10] sm:$0xff]   ;;  %v2680_v14 = vld [vmem:[%s3518_s1 + $0x8] sm:$0xff]   ;;  %v2682_v15 = vld [vmem:[%s3518_s1] sm:$0xff]  }
  0x36   :  { %2378 = vmatpush3.bf16.msra.mxu0 %v2673_v6  ;;  %2403 = vmatprep.subr.bf16.mxu1 %v2943_v1  ;;  %v3098_v28 = vld [vmem:[%s3520_s3] ss:$0 sm:$0xff]  ;;  %v3108_v46 = vld [vmem:[#allocation7 + $0x8] sm:$0xff]   ;;  %v3118_v49 = vld [vmem:[#allocation5 + $0x8] sm:$0xff]  }
  0x37   :  { %109 = vperm.xlu1 %2672, %v92_v4   ;;  %2379 = vmatprep.subr.bf16.mxu0 %v2674_v7  ;;  %v3112_v48 = vld [vmem:[#allocation7] sm:$0xff]   ;;  %v3123_v50 = vld [vmem:[#allocation5] sm:$0xff]  }
  0x38   :  { %103 = vperm.xlu0 %2671, %v90_v5  }
  0x39   :  { %2404 = vmatpush3.bf16.msra.mxu1 %v3053_v10 }
  0x3a   :  { %2380 = vmatpush3.bf16.msra.mxu0 %v2674_v7  ;;  %2409 = vmatprep.subr.bf16.mxu1 %v2943_v1 }
  0x3b   :  { %2381 = vmatprep.subr.bf16.mxu0 %v2675_v8 }
  0x3c   :  { %2406 = vmatmul.mubr.bf16.vlgmr.msra.gmra.mxu1 %v2942_v0 }
  0x3d   :  { %2410 = vmatpush3.bf16.msra.mxu1 %v3050_v9  ;;  %2413 = vmatprep.mubr.msk.bf16.mxu1 %vm2944_vm0, %v2943_v1 }
  0x3e   :  { %2382 = vmatpush3.bf16.msra.mxu0 %v2675_v8  ;;  %2411 = vmatprep.subr.bf16.mxu1 %v2943_v1 }
  0x3f   :  { %2383 = vmatprep.subr.bf16.mxu0 %v2676_v11 }
  0x41   :  { %2412 = vmatpush3.bf16.msra.mxu1 %v3053_v10 }
  0x42   :  { %2384 = vmatpush3.bf16.msra.mxu0 %v2676_v11  ;;  %2417 = vmatprep.subr.bf16.mxu1 %v2943_v1 }
  0x43   :  { %2385 = vmatprep.subr.bf16.mxu0 %v2677_v12 }
  0x46   :  { %2386 = vmatpush3.bf16.msra.mxu0 %v2677_v12 }
  0x47   :  { %2387 = vmatprep.subr.bf16.mxu0 %v2678_v13 }
  0x4a   :  { %2388 = vmatpush3.bf16.msra.mxu0 %v2678_v13 }
  0x4b   :  { %2389 = vmatprep.subr.bf16.mxu0 %v2680_v14 }
  0x4e   :  { %2390 = vmatpush3.bf16.msra.mxu0 %v2680_v14 }
  0x4f   :  { %2391 = vmatprep.subr.bf16.mxu0 %v2682_v15 }
  0x52   :  { %2392 = vmatpush3.bf16.msra.mxu0 %v2682_v15 }
  0x53   :  { %2441 = vmatprep.subr.bf16.mxu0 %v2943_v1 }
  0xae   :  { %v107_v17 = vpop.permute.xlu1 %106 }
  0xaf   :  { %v101_v18 = vpop.permute.xlu0 %100  ;;  %vm125_vm1 = vcmp.eq.s32.totalorder %v3081_v19, %v107_v17 }
  0xb0   :  { %vm123_vm4 = vcmp.eq.s32.totalorder %v3081_v19, %v101_v18 }
  0xb2   :  { %v110_v20 = vpop.permute.xlu1 %109 }
  0xb3   :  { %v104_v21 = vpop.permute.xlu0 %103  ;;  %vm126_vm2 = vcmp.eq.s32.totalorder %v3081_v19, %v110_v20 }
  0xb4   :  { %vm124_vm3 = vcmp.eq.s32.totalorder %v3081_v19, %v104_v21  ;;  %vm2207_vm5 = vmpackc.low %vm126_vm2, %vm125_vm1 }
  0xb5   :  { %vm2205_vm6 = vmpackc.low %vm124_vm3, %vm123_vm4 }
  0xb6   :  { %2393 = vmatprep.mubr.msk.bf16.mxu0 %vm2205_vm6, %v2945_v22 }
  0xb7   :  { %2394 = vmatmul.mubr.msk.bf16.vlgmr.msra.gmra.mxu0 %vm2207_vm5, %v2945_v22 }
  0xb8   :  { %2442 = vmatpush3.bf16.msra.mxu0 %v3050_v9 }
  0xb9   :  { %2443 = vmatprep.subr.bf16.mxu0 %v2943_v1 }
  0xbc   :  { %2444 = vmatpush3.bf16.msra.mxu0 %v3053_v10 }
  0xbd   :  { %2457 = vmatprep.subr.bf16.mxu0 %v2943_v1 }
  0xfc   :  { %v355_v23 = vpop.f32.mrf.mxu1 }
  0xfe   :  { %v2407_v24 = vpop.f32.mrf.mxu1 }
 0x100   :  { %v358_v25 = vpop.f32.mrf.mxu1 }
 0x102   :  { %v2408_v26 = vpop.f32.mrf.mxu1 }
 0x177   :  { %v3093_v27 = vpop.f32.mrf.mxu0 }
 0x179   :  { %v256_v29 = vpop.f32.mrf.mxu0 }
 0x17a   :  { %v257_v30 = vadd.f32 %v3098_v28, %v256_v29 }
 0x17b   :  { %v3133_v51 = vpop.f32.mrf.mxu0 }
 0x17c   :  { %v361_v31 = vadd.f32 %v355_v23, %v257_v30 }
 0x17d   :  { %v259_v52 = vpop.f32.mrf.mxu0 }
 0x17e   :  { %2689 = vtanh.f32 %v361_v31  ;;  %v2215_v33 = vmul.f32 -1.442695, %v361_v31  ;;  %v260_v53 = vadd.f32 %v3098_v28, %v259_v52 }
 0x180   :  { %2691 = vpow2.f32 %v2215_v33 }
 0x18b   :  { %v2690_v32 = vpop.eup %2689 }
 0x18c   :  { %371 = vrot.lane.b32.xlu0 %v2690_v32, %s2938_s14  ;;  %v93_v32 = vld [vmem:[%s3517_s0 + $0x20] sm:$0xff] }
 0x18d   :  { %v2692_v34 = vpop.eup %2691 }
 0x18e   :  { %v365_v35 = vadd.f32 1.0, %v2692_v34 }
 0x190   :  { %2693 = vrcp.f32 %v365_v35  ;;  %v95_v35 = vld [vmem:[%s3517_s0 + $0x30] sm:$0xff] }
 0x19d   :  { %v2694_v36 = vpop.eup %2693 }
 0x19e   :  { %v369_v39 = vmul.f32 0.0, %v2694_v36 }
 0x1fe   :  { %v372_v37 = vpop.permute.xlu0 %371 }
 0x1ff   :  { %v374_v38 = vmul.f32 %v2694_v36, %v372_v37  ;;  %v94_v37 = vld [vmem:[%s3517_s0 + $0x28] sm:$0xff] }
 0x201   :  { %376 = vrot.lane.b32.xlu1 %v374_v38, %s2946_s29  ;;  %v96_v38 = vld [vmem:[%s3517_s0 + $0x38] sm:$0xff] }
 0x273   :  { %v377_v40 = vpop.permute.xlu1 %376 }
 0x274   :  { %v3103_v41 = vadd.f32 %v377_v40, %v369_v39  ;;  %v3167_v40 = vld [vmem:[#allocation8 + $0x8] sm:$0xff]  }
 0x276   :  { %2695 = vtanh.f32 %v3103_v41 }
 0x283   :  { %v2696_v42 = vpop.eup %2695 }
 0x284   :  { %382 = vrot.lane.b32.xlu0 %v2696_v42, %s2938_s14  ;;  %v3170_v42 = vld [vmem:[#allocation8] sm:$0xff]  }
 0x2f6   :  { %v383_v43 = vpop.permute.xlu0 %382 }
 0x2f7   :  { %v385_v44 = vmul.f32 %v2694_v36, %v383_v43 }
 0x2f9   :  { %v386_v45 = vpack.c.bf16 %v385_v44, %v385_v44 }
 0x2fb   :  { %388 = vrot.lane.b32.xlu1 %v386_v45, %s2946_s29 }
 0x36d   :  { %v389_v47 = vpop.permute.xlu1 %388 }
 0x36e   :  { %2414 = vmatmul.mubr.msk.bf16.vlgmr.msra.gmra.mxu1 %vm317_vm7, %v389_v47 }
 0x36f   :  { %2418 = vmatpush3.bf16.msra.mxu1 %v3108_v46  ;;  %2421 = vmatprep.mubr.msk.bf16.mxu1 %vm2944_vm0, %v2943_v1 }
 0x370   :  { %2419 = vmatprep.subr.bf16.mxu1 %v2943_v1 }
 0x373   :  { %2420 = vmatpush3.bf16.msra.mxu1 %v3112_v48 }
 0x374   :  { %2425 = vmatprep.subr.bf16.mxu1 %v2943_v1 }
 0x376   :  { %2422 = vmatmul.mubr.bf16.vlgmr.msra.gmra.mxu1 %v2942_v0  ;;  %v3139_v0 = vld [vmem:[%s3523_s6] ss:$0 sm:$0xff] }
 0x377   :  { %2426 = vmatpush3.bf16.msra.mxu1 %v3118_v49  ;;  %2429 = vmatprep.mubr.msk.bf16.mxu1 %vm2944_vm0, %v2943_v1 }
 0x378   :  { %2427 = vmatprep.subr.bf16.mxu1 %v2943_v1 }
 0x37b   :  { %2428 = vmatpush3.bf16.msra.mxu1 %v3123_v50 }
 0x37c   :  { %2433 = vmatprep.subr.bf16.mxu1 %v2943_v1 }
 0x37e   :  { %2430 = vmatmul.mubr.msk.bf16.vlgmr.msra.gmra.mxu1 %vm317_vm7, %v389_v47 }
 0x37f   :  { %2437 = vmatprep.mubr.msk.bf16.mxu1 %vm2944_vm0, %v2943_v1  ;;  %2434 = vmatpush3.bf16.msra.mxu1 %v3167_v40 }
 0x380   :  { %2435 = vmatprep.subr.bf16.mxu1 %v2943_v1 }
 0x383   :  { %2436 = vmatpush3.bf16.msra.mxu1 %v3170_v42 }
 0x384   :  { %2449 = vmatprep.subr.bf16.mxu1 %v2943_v1 }
 0x42e   :  { %v427_v54 = vpop.f32.mrf.mxu1 }
 0x42f   :  { %v433_v55 = vadd.f32 %v427_v54, %v260_v53 }
 0x430   :  { %v2415_v56 = vpop.f32.mrf.mxu1 }
 0x431   :  { %2697 = vtanh.f32 %v433_v55  ;;  %v2217_v11 = vmul.f32 -1.442695, %v433_v55 }
 0x432   :  { %v430_v57 = vpop.f32.mrf.mxu1 }
 0x434   :  { %v2416_v58 = vpop.f32.mrf.mxu1 }
 0x436   :  { %v504_v59 = vpop.f32.mrf.mxu1 }
 0x438   :  { %v2423_v60 = vpop.f32.mrf.mxu1 }
 0x439   :  { %v265_v60 = vadd.f32 %v3093_v27, %v3098_v28 }
 0x43a   :  { %v507_v61 = vpop.f32.mrf.mxu1 }
 0x43c   :  { %v2424_v62 = vpop.f32.mrf.mxu1 }
 0x43e   :  { %v2698_v63 = vpop.eup %2697  ;;  %v556_v2 = vpop.f32.mrf.mxu1 }
 0x43f   :  { %v557_v3 = vadd.f32 %v556_v2, %v504_v59  ;;  %443 = vrot.lane.b32.xlu0 %v2698_v63, %s2938_s14 }
 0x440   :  { %v2431_v4 = vpop.f32.mrf.mxu1 }
 0x441   :  { %v568_v5 = vadd.f32 %v3139_v0, %v557_v3 }
 0x442   :  { %v559_v6 = vpop.f32.mrf.mxu1 }
 0x443   :  { %2699 = vtanh.f32 %v568_v5  ;;  %v2224_v13 = vmul.f32 -1.442695, %v568_v5 }
 0x444   :  { %v2432_v7 = vpop.f32.mrf.mxu1  ;;  %2701 = vpow2.f32 %v2217_v11  ;;  %v3227_v11 = vld [vmem:[%s3525_s8] ss:$0 sm:$0xff] }
 0x445   :  { %2703 = vpow2.f32 %v2224_v13 }
 0x450   :  { %v2700_v8 = vpop.eup %2699 }
 0x451   :  { %578 = vrot.lane.b32.xlu1 %v2700_v8, %s2938_s14  ;;  %v2702_v12 = vpop.eup %2701 }
 0x452   :  { %v437_v14 = vadd.f32 1.0, %v2702_v12  ;;  %v2704_v15 = vpop.eup %2703 }
 0x453   :  { %v572_v20 = vadd.f32 1.0, %v2704_v15 }
 0x454   :  { %2705 = vrcp.f32 %v437_v14 }
 0x455   :  { %2707 = vrcp.f32 %v572_v20 }
 0x461   :  { %v2706_v16 = vpop.eup %2705 }
 0x462   :  { %v2708_v21 = vpop.eup %2707  ;;  %v441_v25 = vmul.f32 %v2706_v16, %v3103_v41 }
 0x463   :  { %v576_v31 = vmul.f32 0.0, %v2708_v21 }
 0x4b1   :  { %v444_v17 = vpop.permute.xlu0 %443 }
 0x4b2   :  { %v446_v18 = vmul.f32 %v2706_v16, %v444_v17 }
 0x4b4   :  { %448 = vrot.lane.b32.xlu0 %v446_v18, %s2946_s29 }
 0x4c3   :  { %v579_v23 = vpop.permute.xlu1 %578 }
 0x4c4   :  { %v581_v24 = vmul.f32 %v2708_v21, %v579_v23 }
 0x4c6   :  { %583 = vrot.lane.b32.xlu1 %v581_v24, %s2946_s29 }
 0x526   :  { %v449_v26 = vpop.permute.xlu0 %448 }
 0x527   :  { %v3147_v29 = vadd.f32 %v449_v26, %v441_v25 }
 0x529   :  { %2709 = vtanh.f32 %v3147_v29 }
 0x536   :  { %v2710_v30 = vpop.eup %2709 }
 0x537   :  { %454 = vrot.lane.b32.xlu0 %v2710_v30, %s2938_s14 }
 0x538   :  { %v584_v33 = vpop.permute.xlu1 %583 }
 0x539   :  { %v3154_v34 = vadd.f32 %v584_v33, %v576_v31 }
 0x53b   :  { %112 = vperm.xlu0 %2671, %v93_v32   ;;  %2711 = vtanh.f32 %v3154_v34 }
 0x53f   :  { %118 = vperm.xlu0 %2671, %v95_v35  }
 0x548   :  { %v2712_v36 = vpop.eup %2711 }
 0x549   :  { %589 = vrot.lane.b32.xlu1 %v2712_v36, %s2938_s14 }
 0x54d   :  { %115 = vperm.xlu1 %2672, %v94_v37  }
 0x551   :  { %121 = vperm.xlu1 %2672, %v96_v38  }
 0x5a9   :  { %v455_v39 = vpop.permute.xlu0 %454 }
 0x5aa   :  { %v457_v41 = vmul.f32 %v2706_v16, %v455_v39 }
 0x5ac   :  { %v659_v43 = vpack.c.bf16 %v457_v41, %v457_v41 }
 0x5ae   :  { %661 = vrot.lane.b32.xlu1 %v659_v43, %s2946_s29 }
 0x5b6   :  { %v113_v52 = vpop.permute.xlu0 %112 }
 0x5b7   :  { %vm127_vm8 = vcmp.eq.s32.totalorder %v3081_v19, %v113_v52 }
 0x5ba   :  { %v119_v54 = vpop.permute.xlu0 %118 }
 0x5bb   :  { %v590_v44 = vpop.permute.xlu1 %589  ;;  %vm129_vm11 = vcmp.eq.s32.totalorder %v3081_v19, %v119_v54 }
 0x5bc   :  { %v592_v45 = vmul.f32 %v2708_v21, %v590_v44 }
 0x5be   :  { %v593_v47 = vpack.c.bf16 %v592_v45, %v592_v45 }
 0x5c0   :  { %601 = vrot.lane.b32.xlu0 %v593_v47, %s2946_s29 }
 0x5c8   :  { %v116_v53 = vpop.permute.xlu1 %115 }
 0x5c9   :  { %vm128_vm9 = vcmp.eq.s32.totalorder %v3081_v19, %v116_v53 }
 0x5ca   :  { %vm2209_vm10 = vmpackc.low %vm128_vm9, %vm127_vm8 }
 0x5cb   :  { %2397 = vmatprep.mubr.msk.bf16.mxu0 %vm2209_vm10, %v2945_v22 }
 0x5cc   :  { %v122_v55 = vpop.permute.xlu1 %121 }
 0x5cd   :  { %vm130_vm12 = vcmp.eq.s32.totalorder %v3081_v19, %v122_v55 }
 0x5ce   :  { %vm2211_vm13 = vmpackc.low %vm130_vm12, %vm129_vm11 }
 0x5cf   :  { %2398 = vmatmul.mubr.msk.bf16.gmra.mxu0 %vm2211_vm13, %v2945_v22 }
 0x5d0   :  { %2445 = vmatprep.mubr.msk.bf16.mxu0 %vm2944_vm0, %v2943_v1 }
 0x620   :  { %v662_v56 = vpop.permute.xlu1 %661 }
 0x621   :  { %2446 = vmatmul.mubr.msk.bf16.vlgmr.msra.gmra.mxu0 %vm317_vm7, %v662_v56 }
 0x622   :  { %2458 = vmatpush3.bf16.msra.mxu0 %v3118_v49  ;;  %2461 = vmatprep.mubr.msk.bf16.mxu0 %vm2944_vm0, %v2943_v1 }
 0x623   :  { %2459 = vmatprep.subr.bf16.mxu0 %v2943_v1 }
 0x626   :  { %2460 = vmatpush3.bf16.msra.mxu0 %v3123_v50 }
 0x627   :  { %2473 = vmatprep.subr.bf16.mxu0 %v2943_v1 }
 0x629   :  { %2462 = vmatmul.mubr.msk.bf16.vlgmr.msra.gmra.mxu0 %vm317_vm7, %v662_v56 }
 0x62a   :  { %2474 = vmatpush3.bf16.msra.mxu0 %v3050_v9  ;;  %2477 = vmatprep.mubr.msk.bf16.mxu0 %vm2944_vm0, %v2943_v1 }
 0x62b   :  { %2475 = vmatprep.subr.bf16.mxu0 %v2943_v1 }
 0x62e   :  { %2476 = vmatpush3.bf16.msra.mxu0 %v3053_v10 }
 0x62f   :  { %2489 = vmatprep.subr.bf16.mxu0 %v2943_v1 }
 0x632   :  { %v602_v19 = vpop.permute.xlu0 %601 }
 0x633   :  { %2438 = vmatmul.mubr.msk.bf16.vlgmr.msra.gmra.mxu1 %vm317_vm7, %v602_v19 }
 0x634   :  { %2450 = vmatpush3.bf16.msra.mxu1 %v3108_v46  ;;  %2453 = vmatprep.mubr.msk.bf16.mxu1 %vm2944_vm0, %v2943_v1 }
 0x635   :  { %2451 = vmatprep.subr.bf16.mxu1 %v2943_v1 }
 0x638   :  { %2452 = vmatpush3.bf16.msra.mxu1 %v3112_v48 }
 0x639   :  { %2465 = vmatprep.subr.bf16.mxu1 %v2943_v1 }
 0x63b   :  { %2454 = vmatmul.mubr.msk.bf16.vlgmr.msra.gmra.mxu1 %vm317_vm7, %v602_v19 }
 0x63c   :  { %2466 = vmatpush3.bf16.msra.mxu1 %v3167_v40  ;;  %2469 = vmatprep.mubr.msk.bf16.mxu1 %vm2944_vm0, %v2943_v1 }
 0x63d   :  { %2467 = vmatprep.subr.bf16.mxu1 %v2943_v1 }
 0x640   :  { %2468 = vmatpush3.bf16.msra.mxu1 %v3170_v42 }
 0x641   :  { %2481 = vmatprep.subr.bf16.mxu1 %v2943_v1 }
 0x68f   :  { %v3213_v22 = vpop.f32.mrf.mxu0 }
 0x691   :  { %v3215_v57 = vpop.f32.mrf.mxu0 }
 0x693   :  { %v3217_v58 = vpop.f32.mrf.mxu0 }
 0x695   :  { %v3219_v59 = vpop.f32.mrf.mxu0 }
 0x6e1   :  { %v700_v61 = vpop.f32.mrf.mxu0 }
 0x6e2   :  { %v706_v62 = vadd.f32 %v700_v61, %v265_v60 }
 0x6e3   :  { %v2447_v63 = vpop.f32.mrf.mxu0 }
 0x6e4   :  { %2713 = vtanh.f32 %v706_v62  ;;  %v2230_v25 = vmul.f32 -1.442695, %v706_v62 }
 0x6e5   :  { %v703_v2 = vpop.f32.mrf.mxu0 }
 0x6e6   :  { %v268_v2 = vadd.f32 %v3133_v51, %v3098_v28 }
 0x6e7   :  { %v2448_v3 = vpop.f32.mrf.mxu0 }
 0x6e9   :  { %v805_v4 = vpop.f32.mrf.mxu0 }
 0x6eb   :  { %v2463_v5 = vpop.f32.mrf.mxu0 }
 0x6ed   :  { %v808_v6 = vpop.f32.mrf.mxu0 }
 0x6ef   :  { %v2464_v7 = vpop.f32.mrf.mxu0 }
 0x6f1   :  { %v2714_v8 = vpop.eup %2713 }
 0x6f2   :  { %716 = vrot.lane.b32.xlu0 %v2714_v8, %s2938_s14 }
 0x6f3   :  { %v652_v12 = vpop.f32.mrf.mxu1 }
 0x6f4   :  { %v653_v27 = vadd.f32 %v3227_v11, %v652_v12 }
 0x6f5   :  { %v2439_v13 = vpop.f32.mrf.mxu1 }
 0x6f6   :  { %658 = vst [vmem:[#allocation10] sm:$0xff] %v653_v27 }
 0x6f7   :  { %v655_v14 = vpop.f32.mrf.mxu1 }
 0x6f9   :  { %v2440_v15 = vpop.f32.mrf.mxu1 }
 0x6fb   :  { %v765_v16 = vpop.f32.mrf.mxu1 }
 0x6fc   :  { %v806_v17 = vadd.f32 %v805_v4, %v765_v16 }
 0x6fd   :  { %v2455_v18 = vpop.f32.mrf.mxu1 }
 0x6fe   :  { %v811_v20 = vadd.f32 %v3139_v0, %v806_v17 }
 0x6ff   :  { %v768_v21 = vpop.f32.mrf.mxu1 }
 0x700   :  { %2715 = vtanh.f32 %v811_v20  ;;  %v2233_v31 = vmul.f32 -1.442695, %v811_v20 }
 0x701   :  { %v2456_v23 = vpop.f32.mrf.mxu1  ;;  %2717 = vpow2.f32 %v2230_v25 }
 0x70d   :  { %v2716_v24 = vpop.eup %2715 }
 0x70e   :  { %821 = vrot.lane.b32.xlu1 %v2716_v24, %s2938_s14  ;;  %v2718_v26 = vpop.eup %2717 }
 0x70f   :  { %v710_v30 = vadd.f32 1.0, %v2718_v26 }
 0x711   :  { %2719 = vrcp.f32 %v710_v30 }
 0x712   :  { %2721 = vpow2.f32 %v2233_v31 }
 0x71e   :  { %v2720_v32 = vpop.eup %2719 }
 0x71f   :  { %v2722_v36 = vpop.eup %2721  ;;  %v714_v43 = vmul.f32 %v2720_v32, %v3147_v29 }
 0x720   :  { %v815_v37 = vadd.f32 1.0, %v2722_v36 }
 0x722   :  { %2723 = vrcp.f32 %v815_v37 }
 0x72f   :  { %v2724_v38 = vpop.eup %2723 }
 0x730   :  { %v819_v52 = vmul.f32 %v2724_v38, %v3154_v34 }
 0x764   :  { %v717_v33 = vpop.permute.xlu0 %716 }
 0x765   :  { %v719_v35 = vmul.f32 %v2720_v32, %v717_v33 }
 0x767   :  { %721 = vrot.lane.b32.xlu0 %v719_v35, %s2946_s29 }
 0x780   :  { %v822_v39 = vpop.permute.xlu1 %821 }
 0x781   :  { %v824_v41 = vmul.f32 %v2724_v38, %v822_v39 }
 0x783   :  { %826 = vrot.lane.b32.xlu1 %v824_v41, %s2946_s29 }
 0x7d9   :  { %v722_v44 = vpop.permute.xlu0 %721 }
 0x7da   :  { %v3235_v45 = vadd.f32 %v722_v44, %v714_v43 }
 0x7dc   :  { %2725 = vtanh.f32 %v3235_v45 }
 0x7e9   :  { %v2726_v47 = vpop.eup %2725 }
 0x7ea   :  { %727 = vrot.lane.b32.xlu0 %v2726_v47, %s2938_s14 }
 0x7f5   :  { %v827_v53 = vpop.permute.xlu1 %826 }
 0x7f6   :  { %v3240_v54 = vadd.f32 %v827_v53, %v819_v52 }
 0x7f8   :  { %2727 = vtanh.f32 %v3240_v54 }
 0x805   :  { %v2728_v55 = vpop.eup %2727 }
 0x806   :  { %832 = vrot.lane.b32.xlu1 %v2728_v55, %s2938_s14 }
 0x85c   :  { %v728_v56 = vpop.permute.xlu0 %727 }
 0x85d   :  { %v730_v29 = vmul.f32 %v2720_v32, %v728_v56 }
 0x85f   :  { %v884_v19 = vpack.c.bf16 %v730_v29, %v730_v29 }
 0x861   :  { %886 = vrot.lane.b32.xlu1 %v884_v19, %s2946_s29 }
 0x878   :  { %v833_v60 = vpop.permute.xlu1 %832 }
 0x879   :  { %v835_v61 = vmul.f32 %v2724_v38, %v833_v60 }
 0x87b   :  { %v836_v62 = vpack.c.bf16 %v835_v61, %v835_v61 }
 0x87d   :  { %838 = vrot.lane.b32.xlu0 %v836_v62, %s2946_s29 }
 0x8d3   :  { %v887_v63 = vpop.permute.xlu1 %886 }
 0x8d4   :  { %2478 = vmatmul.mubr.msk.bf16.vlgmr.msra.gmra.mxu0 %vm317_vm7, %v887_v63 }
 0x8d5   :  { %2490 = vmatpush3.bf16.msra.mxu0 %v3118_v49  ;;  %2493 = vmatprep.mubr.msk.bf16.mxu0 %vm2944_vm0, %v2943_v1 }
 0x8d6   :  { %2491 = vmatprep.subr.bf16.mxu0 %v2943_v1 }
 0x8d9   :  { %2492 = vmatpush3.bf16.msra.mxu0 %v3123_v50 }
 0x8da   :  { %2505 = vmatprep.subr.bf16.mxu0 %v2943_v1 }
 0x8dc   :  { %2494 = vmatmul.mubr.msk.bf16.vlgmr.msra.gmra.mxu0 %vm317_vm7, %v887_v63 }
 0x8dd   :  { %2506 = vmatpush3.bf16.msra.mxu0 %v3050_v9  ;;  %2509 = vmatprep.mubr.msk.bf16.mxu0 %vm2944_vm0, %v2943_v1 }
 0x8de   :  { %2507 = vmatprep.subr.bf16.mxu0 %v2943_v1 }
 0x8e1   :  { %2508 = vmatpush3.bf16.msra.mxu0 %v3053_v10 }
 0x8e2   :  { %2521 = vmatprep.subr.bf16.mxu0 %v2943_v1 }
 0x8ef   :  { %v839_v34 = vpop.permute.xlu0 %838 }
 0x8f0   :  { %2470 = vmatmul.mubr.msk.bf16.vlgmr.msra.gmra.mxu1 %vm317_vm7, %v839_v34 }
 0x8f1   :  { %2482 = vmatpush3.bf16.msra.mxu1 %v3108_v46  ;;  %2485 = vmatprep.mubr.msk.bf16.mxu1 %vm2944_vm0, %v2943_v1 }
 0x8f2   :  { %2483 = vmatprep.subr.bf16.mxu1 %v2943_v1 }
 0x8f5   :  { %2484 = vmatpush3.bf16.msra.mxu1 %v3112_v48 }
 0x8f6   :  { %2497 = vmatprep.subr.bf16.mxu1 %v2943_v1 }
 0x8f8   :  { %2486 = vmatmul.mubr.msk.bf16.vlgmr.msra.gmra.mxu1 %vm317_vm7, %v839_v34 }
 0x8f9   :  { %2498 = vmatpush3.bf16.msra.mxu1 %v3167_v40  ;;  %2501 = vmatprep.mubr.msk.bf16.mxu1 %vm2944_vm0, %v2943_v1 }
 0x8fa   :  { %2499 = vmatprep.subr.bf16.mxu1 %v2943_v1 }
 0x8fd   :  { %2500 = vmatpush3.bf16.msra.mxu1 %v3170_v42 }
 0x8fe   :  { %2513 = vmatprep.subr.bf16.mxu1 %v2943_v1 }
 0x994   :  { %v925_v3 = vpop.f32.mrf.mxu0 }
 0x995   :  { %v931_v4 = vadd.f32 %v925_v3, %v268_v2 }
 0x996   :  { %v2479_v5 = vpop.f32.mrf.mxu0 }
 0x997   :  { %2729 = vtanh.f32 %v931_v4  ;;  %v2236_v31 = vmul.f32 -1.442695, %v931_v4  ;;  %v273_v5 = vadd.f32 %v3098_v28, %v3215_v57 }
 0x998   :  { %v928_v6 = vpop.f32.mrf.mxu0 }
 0x99a   :  { %v2480_v7 = vpop.f32.mrf.mxu0 }
 0x99c   :  { %v1030_v8 = vpop.f32.mrf.mxu0 }
 0x99e   :  { %v2495_v12 = vpop.f32.mrf.mxu0 }
 0x9a0   :  { %v1033_v27 = vpop.f32.mrf.mxu0 }
 0x9a2   :  { %v2496_v13 = vpop.f32.mrf.mxu0 }
 0x9a4   :  { %v2730_v14 = vpop.eup %2729 }
 0x9a5   :  { %941 = vrot.lane.b32.xlu0 %v2730_v14, %s2938_s14 }
 0x9b0   :  { %v877_v15 = vpop.f32.mrf.mxu1 }
 0x9b1   :  { %v878_v16 = vadd.f32 %v3227_v11, %v877_v15 }
 0x9b2   :  { %v2471_v17 = vpop.f32.mrf.mxu1 }
 0x9b3   :  { %883 = vst [vmem:[#allocation10 + $0x8] sm:$0xff] %v878_v16 }
 0x9b4   :  { %v880_v18 = vpop.f32.mrf.mxu1 }
 0x9b6   :  { %v2472_v51 = vpop.f32.mrf.mxu1 }
 0x9b8   :  { %v990_v20 = vpop.f32.mrf.mxu1 }
 0x9b9   :  { %v1031_v21 = vadd.f32 %v1030_v8, %v990_v20 }
 0x9ba   :  { %v2487_v23 = vpop.f32.mrf.mxu1 }
 0x9bb   :  { %v1036_v24 = vadd.f32 %v3139_v0, %v1031_v21 }
 0x9bc   :  { %v993_v25 = vpop.f32.mrf.mxu1 }
 0x9bd   :  { %2731 = vtanh.f32 %v1036_v24  ;;  %v2239_v38 = vmul.f32 -1.442695, %v1036_v24 }
 0x9be   :  { %v2488_v26 = vpop.f32.mrf.mxu1  ;;  %2733 = vpow2.f32 %v2236_v31 }
 0x9ca   :  { %v2732_v30 = vpop.eup %2731 }
 0x9cb   :  { %1046 = vrot.lane.b32.xlu1 %v2732_v30, %s2938_s14  ;;  %v2734_v32 = vpop.eup %2733 }
 0x9cc   :  { %v935_v33 = vadd.f32 1.0, %v2734_v32 }
 0x9ce   :  { %2735 = vrcp.f32 %v935_v33 }
 0x9cf   :  { %2737 = vpow2.f32 %v2239_v38 }
 0x9db   :  { %v2736_v35 = vpop.eup %2735 }
 0x9dc   :  { %v2738_v39 = vpop.eup %2737  ;;  %v939_v52 = vmul.f32 %v2736_v35, %v3235_v45 }
 0x9dd   :  { %v1040_v41 = vadd.f32 1.0, %v2738_v39 }
 0x9df   :  { %2739 = vrcp.f32 %v1040_v41 }
 0x9ec   :  { %v2740_v43 = vpop.eup %2739 }
 0x9ed   :  { %v1044_v29 = vmul.f32 %v2740_v43, %v3240_v54 }
 0xa17   :  { %v942_v36 = vpop.permute.xlu0 %941 }
 0xa18   :  { %v944_v37 = vmul.f32 %v2736_v35, %v942_v36 }
 0xa1a   :  { %946 = vrot.lane.b32.xlu0 %v944_v37, %s2946_s29 }
 0xa3d   :  { %v1047_v44 = vpop.permute.xlu1 %1046 }
 0xa3e   :  { %v1049_v47 = vmul.f32 %v2740_v43, %v1047_v44 }
 0xa40   :  { %1051 = vrot.lane.b32.xlu1 %v1049_v47, %s2946_s29 }
 0xa8c   :  { %v947_v53 = vpop.permute.xlu0 %946 }
 0xa8d   :  { %v3283_v55 = vadd.f32 %v947_v53, %v939_v52 }
 0xa8f   :  { %2741 = vtanh.f32 %v3283_v55 }
 0xa9c   :  { %v2742_v56 = vpop.eup %2741 }
 0xa9d   :  { %952 = vrot.lane.b32.xlu0 %v2742_v56, %s2938_s14 }
 0xab2   :  { %v1052_v19 = vpop.permute.xlu1 %1051 }
 0xab3   :  { %v3288_v60 = vadd.f32 %v1052_v19, %v1044_v29 }
 0xab5   :  { %2743 = vtanh.f32 %v3288_v60 }
 0xac2   :  { %v2744_v61 = vpop.eup %2743 }
 0xac3   :  { %1057 = vrot.lane.b32.xlu1 %v2744_v61, %s2938_s14 }
 0xb0f   :  { %v953_v62 = vpop.permute.xlu0 %952 }
 0xb10   :  { %v955_v45 = vmul.f32 %v2736_v35, %v953_v62 }
 0xb12   :  { %v1109_v63 = vpack.c.bf16 %v955_v45, %v955_v45 }
 0xb14   :  { %1111 = vrot.lane.b32.xlu1 %v1109_v63, %s2946_s29 }
 0xb35   :  { %v1058_v34 = vpop.permute.xlu1 %1057 }
 0xb36   :  { %v1060_v2 = vmul.f32 %v2740_v43, %v1058_v34 }
 0xb38   :  { %v1061_v3 = vpack.c.bf16 %v1060_v2, %v1060_v2 }
 0xb3a   :  { %1063 = vrot.lane.b32.xlu0 %v1061_v3, %s2946_s29 }
 0xb86   :  { %v1112_v4 = vpop.permute.xlu1 %1111 }
 0xb87   :  { %2510 = vmatmul.mubr.msk.bf16.vlgmr.msra.gmra.mxu0 %vm317_vm7, %v1112_v4 }
 0xb88   :  { %2522 = vmatpush3.bf16.msra.mxu0 %v3118_v49  ;;  %2525 = vmatprep.mubr.msk.bf16.mxu0 %vm2944_vm0, %v2943_v1 }
 0xb89   :  { %2523 = vmatprep.subr.bf16.mxu0 %v2943_v1 }
 0xb8c   :  { %2524 = vmatpush3.bf16.msra.mxu0 %v3123_v50 }
 0xb8d   :  { %2537 = vmatprep.subr.bf16.mxu0 %v2943_v1 }
 0xb8f   :  { %2526 = vmatmul.mubr.msk.bf16.vlgmr.msra.gmra.mxu0 %vm317_vm7, %v1112_v4 }
 0xb90   :  { %2538 = vmatpush3.bf16.msra.mxu0 %v3050_v9  ;;  %2541 = vmatprep.mubr.msk.bf16.mxu0 %vm2944_vm0, %v2943_v1 }
 0xb91   :  { %2539 = vmatprep.subr.bf16.mxu0 %v2943_v1 }
 0xb94   :  { %2540 = vmatpush3.bf16.msra.mxu0 %v3053_v10 }
 0xb95   :  { %2553 = vmatprep.subr.bf16.mxu0 %v2943_v1 }
 0xbac   :  { %v1064_v54 = vpop.permute.xlu0 %1063 }
 0xbad   :  { %2502 = vmatmul.mubr.msk.bf16.vlgmr.msra.gmra.mxu1 %vm317_vm7, %v1064_v54 }
 0xbae   :  { %2514 = vmatpush3.bf16.msra.mxu1 %v3108_v46  ;;  %2517 = vmatprep.mubr.msk.bf16.mxu1 %vm2944_vm0, %v2943_v1 }
 0xbaf   :  { %2515 = vmatprep.subr.bf16.mxu1 %v2943_v1 }
 0xbb2   :  { %2516 = vmatpush3.bf16.msra.mxu1 %v3112_v48 }
 0xbb3   :  { %2529 = vmatprep.subr.bf16.mxu1 %v2943_v1 }
 0xbb5   :  { %2518 = vmatmul.mubr.msk.bf16.vlgmr.msra.gmra.mxu1 %vm317_vm7, %v1064_v54 }
 0xbb6   :  { %2530 = vmatpush3.bf16.msra.mxu1 %v3167_v40  ;;  %2533 = vmatprep.mubr.msk.bf16.mxu1 %vm2944_vm0, %v2943_v1 }
 0xbb7   :  { %2531 = vmatprep.subr.bf16.mxu1 %v2943_v1 }
 0xbba   :  { %2532 = vmatpush3.bf16.msra.mxu1 %v3170_v42 }
 0xbbb   :  { %2545 = vmatprep.subr.bf16.mxu1 %v2943_v1 }
 0xc47   :  { %v1150_v6 = vpop.f32.mrf.mxu0 }
 0xc48   :  { %v1156_v7 = vadd.f32 %v1150_v6, %v273_v5 }
 0xc49   :  { %v2511_v8 = vpop.f32.mrf.mxu0 }
 0xc4a   :  { %2745 = vtanh.f32 %v1156_v7  ;;  %v2242_v33 = vmul.f32 -1.442695, %v1156_v7 }
 0xc4b   :  { %v1153_v12 = vpop.f32.mrf.mxu0 }
 0xc4d   :  { %v2512_v27 = vpop.f32.mrf.mxu0 }
 0xc4f   :  { %v1255_v13 = vpop.f32.mrf.mxu0 }
 0xc51   :  { %v2527_v14 = vpop.f32.mrf.mxu0 }
 0xc53   :  { %v1258_v15 = vpop.f32.mrf.mxu0 }
 0xc55   :  { %v2528_v16 = vpop.f32.mrf.mxu0 }
 0xc57   :  { %v2746_v17 = vpop.eup %2745 }
 0xc58   :  { %1166 = vrot.lane.b32.xlu0 %v2746_v17, %s2938_s14 }
 0xc6d   :  { %v1102_v18 = vpop.f32.mrf.mxu1 }
 0xc6e   :  { %v1103_v51 = vadd.f32 %v3227_v11, %v1102_v18 }
 0xc6f   :  { %v2503_v20 = vpop.f32.mrf.mxu1 }
 0xc70   :  { %1108 = vst [vmem:[#allocation10 + $0x10] sm:$0xff] %v1103_v51 }
 0xc71   :  { %v1105_v21 = vpop.f32.mrf.mxu1 }
 0xc73   :  { %v2504_v57 = vpop.f32.mrf.mxu1 }
 0xc75   :  { %v1215_v23 = vpop.f32.mrf.mxu1 }
 0xc76   :  { %v1256_v24 = vadd.f32 %v1255_v13, %v1215_v23 }
 0xc77   :  { %v2519_v25 = vpop.f32.mrf.mxu1 }
 0xc78   :  { %v1261_v26 = vadd.f32 %v3139_v0, %v1256_v24 }
 0xc79   :  { %v1218_v30 = vpop.f32.mrf.mxu1 }
 0xc7a   :  { %2747 = vtanh.f32 %v1261_v26  ;;  %v2245_v41 = vmul.f32 -1.442695, %v1261_v26 }
 0xc7b   :  { %v2520_v31 = vpop.f32.mrf.mxu1  ;;  %2749 = vpow2.f32 %v2242_v33 }
 0xc87   :  { %v2748_v32 = vpop.eup %2747 }
 0xc88   :  { %1271 = vrot.lane.b32.xlu1 %v2748_v32, %s2938_s14  ;;  %v2750_v35 = vpop.eup %2749 }
 0xc89   :  { %v1160_v36 = vadd.f32 1.0, %v2750_v35 }
 0xc8b   :  { %2751 = vrcp.f32 %v1160_v36 }
 0xc8c   :  { %2753 = vpow2.f32 %v2245_v41 }
 0xc98   :  { %v2752_v37 = vpop.eup %2751 }
 0xc99   :  { %v2754_v43 = vpop.eup %2753  ;;  %v1164_v56 = vmul.f32 %v2752_v37, %v3283_v55 }
 0xc9a   :  { %v1265_v44 = vadd.f32 1.0, %v2754_v43 }
 0xc9c   :  { %2755 = vrcp.f32 %v1265_v44 }
 0xca9   :  { %v2756_v47 = vpop.eup %2755 }
 0xcaa   :  { %v1269_v62 = vmul.f32 %v2756_v47, %v3288_v60 }
 0xcca   :  { %v1167_v38 = vpop.permute.xlu0 %1166 }
 0xccb   :  { %v1169_v39 = vmul.f32 %v2752_v37, %v1167_v38 }
 0xccd   :  { %1171 = vrot.lane.b32.xlu0 %v1169_v39, %s2946_s29 }
 0xcfa   :  { %v1272_v52 = vpop.permute.xlu1 %1271 }
 0xcfb   :  { %v1274_v53 = vmul.f32 %v2756_v47, %v1272_v52 }
 0xcfd   :  { %1276 = vrot.lane.b32.xlu1 %v1274_v53, %s2946_s29 }
 0xd3f   :  { %v1172_v29 = vpop.permute.xlu0 %1171 }
 0xd40   :  { %v3331_v19 = vadd.f32 %v1172_v29, %v1164_v56 }
 0xd42   :  { %2757 = vtanh.f32 %v3331_v19 }
 0xd4f   :  { %v2758_v61 = vpop.eup %2757 }
 0xd50   :  { %1177 = vrot.lane.b32.xlu0 %v2758_v61, %s2938_s14 }
 0xd6f   :  { %v1277_v45 = vpop.permute.xlu1 %1276 }
 0xd70   :  { %v3336_v63 = vadd.f32 %v1277_v45, %v1269_v62 }
 0xd72   :  { %2759 = vtanh.f32 %v3336_v63 }
 0xd7f   :  { %v2760_v34 = vpop.eup %2759 }
 0xd80   :  { %1282 = vrot.lane.b32.xlu1 %v2760_v34, %s2938_s14 }
 0xdc2   :  { %v1178_v2 = vpop.permute.xlu0 %1177 }
 0xdc3   :  { %v1180_v55 = vmul.f32 %v2752_v37, %v1178_v2 }
 0xdc5   :  { %v1334_v3 = vpack.c.bf16 %v1180_v55, %v1180_v55 }
 0xdc7   :  { %1336 = vrot.lane.b32.xlu1 %v1334_v3, %s2946_s29 }
 0xdf2   :  { %v1283_v4 = vpop.permute.xlu1 %1282 }
 0xdf3   :  { %v1285_v54 = vmul.f32 %v2756_v47, %v1283_v4 }
 0xdf5   :  { %v1286_v5 = vpack.c.bf16 %v1285_v54, %v1285_v54 }
 0xdf7   :  { %1288 = vrot.lane.b32.xlu0 %v1286_v5, %s2946_s29 }
 0xe39   :  { %v1337_v6 = vpop.permute.xlu1 %1336 }
 0xe3a   :  { %2542 = vmatmul.mubr.msk.bf16.vlgmr.msra.gmra.mxu0 %vm317_vm7, %v1337_v6 }
 0xe3b   :  { %2554 = vmatpush3.bf16.msra.mxu0 %v3118_v49  ;;  %2557 = vmatprep.mubr.msk.bf16.mxu0 %vm2944_vm0, %v2943_v1 }
 0xe3c   :  { %2555 = vmatprep.subr.bf16.mxu0 %v2943_v1 }
 0xe3f   :  { %2556 = vmatpush3.bf16.msra.mxu0 %v3123_v50 }
 0xe40   :  { %2569 = vmatprep.subr.bf16.mxu0 %v2943_v1 }
 0xe42   :  { %2558 = vmatmul.mubr.msk.bf16.vlgmr.msra.gmra.mxu0 %vm317_vm7, %v1337_v6  ;;  %v2818_v6 = vld [vmem:[#allocation2] sm:$0xff]  }
 0xe43   :  { %2570 = vmatpush3.bf16.msra.mxu0 %v3050_v9  ;;  %2573 = vmatprep.mubr.msk.bf16.mxu0 %vm2944_vm0, %v2943_v1  ;;  %v276_v9 = vadd.f32 %v3098_v28, %v3219_v59 }
 0xe44   :  { %2571 = vmatprep.subr.bf16.mxu0 %v2943_v1 }
 0xe47   :  { %2572 = vmatpush3.bf16.msra.mxu0 %v3053_v10 }
 0xe48   :  { %2585 = vmatprep.subr.bf16.mxu0 %v2943_v1 }
 0xe69   :  { %v1289_v60 = vpop.permute.xlu0 %1288 }
 0xe6a   :  { %2534 = vmatmul.mubr.msk.bf16.vlgmr.msra.gmra.mxu1 %vm317_vm7, %v1289_v60 }
 0xe6b   :  { %2546 = vmatpush3.bf16.msra.mxu1 %v3108_v46  ;;  %2549 = vmatprep.mubr.msk.bf16.mxu1 %vm2944_vm0, %v2943_v1 }
 0xe6c   :  { %2547 = vmatprep.subr.bf16.mxu1 %v2943_v1 }
 0xe6f   :  { %2548 = vmatpush3.bf16.msra.mxu1 %v3112_v48 }
 0xe70   :  { %2561 = vmatprep.subr.bf16.mxu1 %v2943_v1 }
 0xe72   :  { %2550 = vmatmul.mubr.msk.bf16.vlgmr.msra.gmra.mxu1 %vm317_vm7, %v1289_v60 }
 0xe73   :  { %2562 = vmatpush3.bf16.msra.mxu1 %v3167_v40  ;;  %2565 = vmatprep.mubr.msk.bf16.mxu1 %vm2944_vm0, %v2943_v1 }
 0xe74   :  { %2563 = vmatprep.subr.bf16.mxu1 %v2943_v1 }
 0xe77   :  { %2564 = vmatpush3.bf16.msra.mxu1 %v3170_v42 }
 0xe78   :  { %2577 = vmatprep.subr.bf16.mxu1 %v2943_v1 }
 0xefa   :  { %v1375_v10 = vpop.f32.mrf.mxu0 }
 0xefb   :  { %v1381_v7 = vadd.f32 %v1375_v10, %v276_v9 }
 0xefc   :  { %v2543_v8 = vpop.f32.mrf.mxu0 }
 0xefd   :  { %2761 = vtanh.f32 %v1381_v7  ;;  %v2248_v31 = vmul.f32 -1.442695, %v1381_v7 }
 0xefe   :  { %v1378_v12 = vpop.f32.mrf.mxu0 }
 0xf00   :  { %v2544_v27 = vpop.f32.mrf.mxu0 }
 0xf02   :  { %v1480_v13 = vpop.f32.mrf.mxu0 }
 0xf04   :  { %v2559_v14 = vpop.f32.mrf.mxu0 }
 0xf06   :  { %v1483_v15 = vpop.f32.mrf.mxu0 }
 0xf08   :  { %v2560_v16 = vpop.f32.mrf.mxu0 }
 0xf0a   :  { %v2762_v17 = vpop.eup %2761 }
 0xf0b   :  { %1391 = vrot.lane.b32.xlu0 %v2762_v17, %s2938_s14 }
 0xf2a   :  { %v1327_v18 = vpop.f32.mrf.mxu1 }
 0xf2b   :  { %v1328_v51 = vadd.f32 %v3227_v11, %v1327_v18 }
 0xf2c   :  { %v2535_v20 = vpop.f32.mrf.mxu1 }
 0xf2d   :  { %1333 = vst [vmem:[#allocation10 + $0x18] sm:$0xff] %v1328_v51 }
 0xf2e   :  { %v1330_v21 = vpop.f32.mrf.mxu1 }
 0xf30   :  { %v2536_v28 = vpop.f32.mrf.mxu1 }
 0xf32   :  { %v1440_v59 = vpop.f32.mrf.mxu1 }
 0xf33   :  { %v1481_v57 = vadd.f32 %v1480_v13, %v1440_v59 }
 0xf34   :  { %v2551_v23 = vpop.f32.mrf.mxu1 }
 0xf35   :  { %v1486_v24 = vadd.f32 %v3139_v0, %v1481_v57 }
 0xf36   :  { %v1443_v25 = vpop.f32.mrf.mxu1 }
 0xf37   :  { %2763 = vtanh.f32 %v1486_v24  ;;  %v2251_v38 = vmul.f32 -1.442695, %v1486_v24 }
 0xf38   :  { %v2552_v26 = vpop.f32.mrf.mxu1  ;;  %2765 = vpow2.f32 %v2248_v31 }
 0xf44   :  { %v2764_v30 = vpop.eup %2763 }
 0xf45   :  { %1496 = vrot.lane.b32.xlu1 %v2764_v30, %s2938_s14  ;;  %v2766_v32 = vpop.eup %2765 }
 0xf46   :  { %v1385_v33 = vadd.f32 1.0, %v2766_v32 }
 0xf48   :  { %2767 = vrcp.f32 %v1385_v33 }
 0xf49   :  { %2769 = vpow2.f32 %v2251_v38 }
 0xf55   :  { %v2768_v35 = vpop.eup %2767 }
 0xf56   :  { %v2770_v39 = vpop.eup %2769  ;;  %v1389_v52 = vmul.f32 %v2768_v35, %v3331_v19 }
 0xf57   :  { %v1490_v41 = vadd.f32 1.0, %v2770_v39 }
 0xf59   :  { %2771 = vrcp.f32 %v1490_v41 }
 0xf66   :  { %v2772_v43 = vpop.eup %2771 }
 0xf67   :  { %v1494_v61 = vmul.f32 %v2772_v43, %v3336_v63  ;;  %v2817_v63 = vld [vmem:[#allocation2 + $0x8] sm:$0xff]  }
 0xf7d   :  { %v1392_v36 = vpop.permute.xlu0 %1391 }
 0xf7e   :  { %v1394_v37 = vmul.f32 %v2768_v35, %v1392_v36 }
 0xf80   :  { %1396 = vrot.lane.b32.xlu0 %v1394_v37, %s2946_s29 }
 0xfb7   :  { %v1497_v44 = vpop.permute.xlu1 %1496 }
 0xfb8   :  { %v1499_v47 = vmul.f32 %v2772_v43, %v1497_v44 }
 0xfba   :  { %1501 = vrot.lane.b32.xlu1 %v1499_v47, %s2946_s29 }
 0xff2   :  { %v1397_v53 = vpop.permute.xlu0 %1396 }
 0xff3   :  { %v3379_v56 = vadd.f32 %v1397_v53, %v1389_v52 }
 0xff5   :  { %2773 = vtanh.f32 %v3379_v56 }
0x1002   :  { %v2774_v29 = vpop.eup %2773 }
0x1003   :  { %1402 = vrot.lane.b32.xlu0 %v2774_v29, %s2938_s14 }
0x102c   :  { %v1502_v62 = vpop.permute.xlu1 %1501 }
0x102d   :  { %v3384_v45 = vadd.f32 %v1502_v62, %v1494_v61 }
0x102f   :  { %2775 = vtanh.f32 %v3384_v45 }
0x103c   :  { %v2776_v34 = vpop.eup %2775 }
0x103d   :  { %1507 = vrot.lane.b32.xlu1 %v2776_v34, %s2938_s14 }
0x1075   :  { %v1403_v2 = vpop.permute.xlu0 %1402 }
0x1076   :  { %v1405_v19 = vmul.f32 %v2768_v35, %v1403_v2 }
0x1078   :  { %v1559_v55 = vpack.c.bf16 %v1405_v19, %v1405_v19  ;;  %v3448_v19 = vld [vmem:[#allocation5] sm:$0xff]  }
0x107a   :  { %1561 = vrot.lane.b32.xlu1 %v1559_v55, %s2946_s29  ;;  %v2822_v55 = vld [vmem:[#allocation7 + $0x8] sm:$0xff]  }
0x10af   :  { %v1508_v3 = vpop.permute.xlu1 %1507 }
0x10b0   :  { %v1510_v4 = vmul.f32 %v2772_v43, %v1508_v3  ;;  %v2823_v3 = vld [vmem:[#allocation7] sm:$0xff]  }
0x10b2   :  { %v1511_v54 = vpack.c.bf16 %v1510_v4, %v1510_v4 }
0x10b4   :  { %1513 = vrot.lane.b32.xlu0 %v1511_v54, %s2946_s29  ;;  %v3463_v54 = vld [vmem:[#allocation8 + $0x8] sm:$0xff]  }
0x10ec   :  { %v1562_v5 = vpop.permute.xlu1 %1561 }
0x10ed   :  { %2574 = vmatmul.mubr.msk.bf16.vlgmr.msra.gmra.mxu0 %vm317_vm7, %v1562_v5 }
0x10ee   :  { %2586 = vmatpush3.bf16.msra.mxu0 %v3118_v49  ;;  %2589 = vmatprep.mubr.msk.bf16.mxu0 %vm2944_vm0, %v2943_v1 }
0x10ef   :  { %2587 = vmatprep.subr.bf16.mxu0 %v2943_v1 }
0x10f2   :  { %2588 = vmatpush3.bf16.msra.mxu0 %v3123_v50 }
0x10f3   :  { %2601 = vmatprep.subr.bf16.mxu0 %v2943_v1 }
0x10f5   :  { %2590 = vmatmul.mubr.msk.bf16.vlgmr.msra.gmra.mxu0 %vm317_vm7, %v1562_v5  ;;  %v3469_v5 = vld [vmem:[#allocation8] sm:$0xff]  }
0x10f6   :  { %2602 = vmatpush3.bf16.msra.mxu0 %v2817_v63  ;;  %2605 = vmatprep.mubr.msk.bf16.mxu0 %vm2944_vm0, %v2943_v1 }
0x10f7   :  { %2603 = vmatprep.subr.bf16.mxu0 %v2943_v1 }
0x10fa   :  { %2604 = vmatpush3.bf16.msra.mxu0 %v2818_v6 }
0x10fb   :  { %2617 = vmatprep.subr.bf16.mxu0 %v2943_v1 }
0x1126   :  { %v1514_v49 = vpop.permute.xlu0 %1513 }
0x1127   :  { %2566 = vmatmul.mubr.msk.bf16.vlgmr.msra.gmra.mxu1 %vm317_vm7, %v1514_v49 }
0x1128   :  { %2578 = vmatpush3.bf16.msra.mxu1 %v3108_v46  ;;  %2581 = vmatprep.mubr.msk.bf16.mxu1 %vm2944_vm0, %v2943_v1  ;;  %v3419_v46 = vld [vmem:[%s3520_s3] ss:$0 sm:$0xff] }
0x1129   :  { %2579 = vmatprep.subr.bf16.mxu1 %v2943_v1  ;;  %v284_v63 = vadd.f32 %v3419_v46, %v3217_v58 }
0x112c   :  { %2580 = vmatpush3.bf16.msra.mxu1 %v3112_v48  ;;  %v281_v48 = vadd.f32 %v3419_v46, %v3213_v22 }
0x112d   :  { %2593 = vmatprep.subr.bf16.mxu1 %v2943_v1 }
0x112f   :  { %2582 = vmatmul.mubr.msk.bf16.vlgmr.msra.gmra.mxu1 %vm317_vm7, %v1514_v49 }
0x1130   :  { %2594 = vmatpush3.bf16.msra.mxu1 %v3167_v40  ;;  %2597 = vmatprep.mubr.msk.bf16.mxu1 %vm2944_vm0, %v2943_v1 }
0x1131   :  { %2595 = vmatprep.subr.bf16.mxu1 %v2943_v1 }
0x1134   :  { %2596 = vmatpush3.bf16.msra.mxu1 %v3170_v42 }
0x1135   :  { %2609 = vmatprep.subr.bf16.mxu1 %v2943_v1 }
0x11ad   :  { %v1600_v50 = vpop.f32.mrf.mxu0 }
0x11ae   :  { %v1606_v60 = vadd.f32 %v1600_v50, %v281_v48 }
0x11af   :  { %v2575_v40 = vpop.f32.mrf.mxu0 }
0x11b0   :  { %2777 = vtanh.f32 %v1606_v60  ;;  %v2254_v57 = vmul.f32 -1.442695, %v1606_v60 }
0x11b1   :  { %v1603_v9 = vpop.f32.mrf.mxu0 }
0x11b3   :  { %v2576_v10 = vpop.f32.mrf.mxu0 }
0x11b5   :  { %v1705_v7 = vpop.f32.mrf.mxu0 }
0x11b7   :  { %v2591_v8 = vpop.f32.mrf.mxu0 }
0x11b9   :  { %v1708_v12 = vpop.f32.mrf.mxu0 }
0x11bb   :  { %v2592_v42 = vpop.f32.mrf.mxu0 }
0x11bd   :  { %v2778_v27 = vpop.eup %2777 }
0x11be   :  { %1616 = vrot.lane.b32.xlu0 %v2778_v27, %s2938_s14 }
0x11e7   :  { %v1552_v13 = vpop.f32.mrf.mxu1 }
0x11e8   :  { %v1553_v14 = vadd.f32 %v3227_v11, %v1552_v13 }
0x11e9   :  { %v2567_v15 = vpop.f32.mrf.mxu1 }
0x11ea   :  { %1558 = vst [vmem:[#allocation10 + $0x20] sm:$0xff] %v1553_v14 }
0x11eb   :  { %v1555_v16 = vpop.f32.mrf.mxu1 }
0x11ec   :  { %v3480_v16 = vld [vmem:[%s3523_s6] ss:$0 sm:$0xff] }
0x11ed   :  { %v2568_v22 = vpop.f32.mrf.mxu1 }
0x11ef   :  { %v1665_v17 = vpop.f32.mrf.mxu1 }
0x11f0   :  { %v1706_v18 = vadd.f32 %v1705_v7, %v1665_v17 }
0x11f1   :  { %v2583_v51 = vpop.f32.mrf.mxu1 }
0x11f2   :  { %v1711_v20 = vadd.f32 %v3139_v0, %v1706_v18 }
0x11f3   :  { %v1668_v21 = vpop.f32.mrf.mxu1 }
0x11f4   :  { %2779 = vtanh.f32 %v1711_v20  ;;  %v2257_v31 = vmul.f32 -1.442695, %v1711_v20 }
0x11f5   :  { %v2584_v28 = vpop.f32.mrf.mxu1  ;;  %2781 = vpow2.f32 %v2254_v57 }
0x1201   :  { %v2780_v59 = vpop.eup %2779 }
0x1202   :  { %1721 = vrot.lane.b32.xlu1 %v2780_v59, %s2938_s14  ;;  %v2782_v23 = vpop.eup %2781 }
0x1203   :  { %v1610_v24 = vadd.f32 1.0, %v2782_v23 }
0x1205   :  { %2783 = vrcp.f32 %v1610_v24 }
0x1206   :  { %2785 = vpow2.f32 %v2257_v31 }
0x1212   :  { %v2784_v25 = vpop.eup %2783 }
0x1213   :  { %v2786_v32 = vpop.eup %2785  ;;  %v1614_v37 = vmul.f32 %v2784_v25, %v3379_v56 }
0x1214   :  { %v1715_v0 = vadd.f32 1.0, %v2786_v32 }
0x1216   :  { %2787 = vrcp.f32 %v1715_v0 }
0x1223   :  { %v2788_v33 = vpop.eup %2787 }
0x1224   :  { %v1719_v43 = vmul.f32 %v2788_v33, %v3384_v45  ;;  %v3442_v45 = vld [vmem:[#allocation5 + $0x8] sm:$0xff]  }
0x1230   :  { %v1617_v26 = vpop.permute.xlu0 %1616 }
0x1231   :  { %v1619_v30 = vmul.f32 %v2784_v25, %v1617_v26 }
0x1233   :  { %1621 = vrot.lane.b32.xlu0 %v1619_v30, %s2946_s29 }
0x1274   :  { %v1722_v35 = vpop.permute.xlu1 %1721 }
0x1275   :  { %v1724_v36 = vmul.f32 %v2788_v33, %v1722_v35 }
0x1277   :  { %1726 = vrot.lane.b32.xlu1 %v1724_v36, %s2946_s29 }
0x12a5   :  { %v1622_v38 = vpop.permute.xlu0 %1621 }
0x12a6   :  { %v3430_v39 = vadd.f32 %v1622_v38, %v1614_v37 }
0x12a8   :  { %2789 = vtanh.f32 %v3430_v39 }
0x12b5   :  { %v2790_v41 = vpop.eup %2789 }
0x12b6   :  { %1627 = vrot.lane.b32.xlu0 %v2790_v41, %s2938_s14 }
0x12e9   :  { %v1727_v44 = vpop.permute.xlu1 %1726 }
0x12ea   :  { %v3435_v47 = vadd.f32 %v1727_v44, %v1719_v43 }
0x12ec   :  { %2791 = vtanh.f32 %v3435_v47 }
0x12f9   :  { %v2792_v52 = vpop.eup %2791 }
0x12fa   :  { %1732 = vrot.lane.b32.xlu1 %v2792_v52, %s2938_s14 }
0x1328   :  { %v1628_v53 = vpop.permute.xlu0 %1627 }
0x1329   :  { %v1630_v56 = vmul.f32 %v2784_v25, %v1628_v53 }
0x132b   :  { %v1784_v29 = vpack.c.bf16 %v1630_v56, %v1630_v56 }
0x132d   :  { %1786 = vrot.lane.b32.xlu1 %v1784_v29, %s2946_s29 }
0x136c   :  { %v1733_v61 = vpop.permute.xlu1 %1732 }
0x136d   :  { %v1735_v62 = vmul.f32 %v2788_v33, %v1733_v61 }
0x136f   :  { %v1736_v34 = vpack.c.bf16 %v1735_v62, %v1735_v62 }
0x1371   :  { %1738 = vrot.lane.b32.xlu0 %v1736_v34, %s2946_s29  ;;  %v2827_v34 = vld [vmem:[%s3525_s8] ss:$0 sm:$0xff]  ;;  %s2947_s8 = smov [#allocation10]  }
0x1372   :  { %s2174_s24 = sshll.u32 %s2947_s8, 4  ;;  %s2175_s24 = int_to_ptr.vmem [resolvable:$true] %s2174_s24 }
0x1373   :  { %s2908_s4 = scalar_lea.vmem %s2175_s24, 1024  ;;  %p2913_p7 = scmp.lt.s32.totalorder %s2175_s24, %s2175_s24 }
0x1374   :  { %p2909_p6 = scmp.ne.s32.totalorder %s2175_s24, %s2908_s4  ;;  %p2914_p8 = scmp.lt.s32.totalorder %s2908_s4, %s2908_s4 }
0x1376   :  { %p2915_p9 = por %p2914_p8, %p2913_p7 }
0x1378   :  { %p2916_p10 = pnand %p2915_p9, %p2909_p6 }
0x139f   :  { %v1787_v2 = vpop.permute.xlu1 %1786 }
0x13a0   :  { %2606 = vmatmul.mubr.msk.bf16.vlgmr.msra.gmra.mxu0 %vm317_vm7, %v1787_v2 }
0x13a1   :  { %2618 = vmatpush3.bf16.msra.mxu0 %v3442_v45  ;;  %2621 = vmatprep.mubr.msk.bf16.mxu0 %vm2944_vm0, %v2943_v1 }
0x13a2   :  { %2619 = vmatprep.subr.bf16.mxu0 %v2943_v1 }
0x13a5   :  { %2620 = vmatpush3.bf16.msra.mxu0 %v3448_v19 }
0x13a6   :  { %2633 = vmatprep.subr.bf16.mxu0 %v2943_v1 }
0x13a8   :  { %2622 = vmatmul.mubr.msk.bf16.vlgmr.msra.gmra.mxu0 %vm317_vm7, %v1787_v2 }
0x13a9   :  { %2634 = vmatpush3.bf16.msra.mxu0 %v2822_v55  ;;  %2637 = vmatprep.mubr.msk.bf16.mxu0 %vm2944_vm0, %v2943_v1 }
0x13aa   :  { %2635 = vmatprep.subr.bf16.mxu0 %v2943_v1 }
0x13ad   :  { %2636 = vmatpush3.bf16.msra.mxu0 %v2823_v3 }
0x13ae   :  { %2649 = vmatprep.subr.bf16.mxu0 %v2943_v1 }
0x13e3   :  { %v1739_v4 = vpop.permute.xlu0 %1738 }
0x13e4   :  { %2598 = vmatmul.mubr.msk.bf16.vlgmr.msra.gmra.mxu1 %vm317_vm7, %v1739_v4 }
0x13e5   :  { %2610 = vmatpush3.bf16.msra.mxu1 %v2822_v55  ;;  %2613 = vmatprep.mubr.msk.bf16.mxu1 %vm2944_vm0, %v2943_v1 }
0x13e6   :  { %2611 = vmatprep.subr.bf16.mxu1 %v2943_v1 }
0x13e9   :  { %2612 = vmatpush3.bf16.msra.mxu1 %v2823_v3 }
0x13ea   :  { %2625 = vmatprep.subr.bf16.mxu1 %v2943_v1 }
0x13ec   :  { %2614 = vmatmul.mubr.msk.bf16.vlgmr.msra.gmra.mxu1 %vm317_vm7, %v1739_v4 }
0x13ed   :  { %2626 = vmatpush3.bf16.msra.mxu1 %v3463_v54  ;;  %2629 = vmatprep.mubr.msk.bf16.mxu1 %vm2944_vm0, %v2943_v1 }
0x13ee   :  { %2627 = vmatprep.subr.bf16.mxu1 %v2943_v1 }
0x13f1   :  { %2628 = vmatpush3.bf16.msra.mxu1 %v3469_v5 }
0x13f2   :  { %2641 = vmatprep.subr.bf16.mxu1 %v2943_v1 }
0x1460   :  { %v1825_v6 = vpop.f32.mrf.mxu0 }
0x1461   :  { %v1831_v49 = vadd.f32 %v1825_v6, %v284_v63 }
0x1462   :  { %v2607_v48 = vpop.f32.mrf.mxu0 }
0x1463   :  { %2793 = vtanh.f32 %v1831_v49  ;;  %v2260_v51 = vmul.f32 -1.442695, %v1831_v49 }
0x1464   :  { %v1828_v50 = vpop.f32.mrf.mxu0 }
0x1466   :  { %v2608_v60 = vpop.f32.mrf.mxu0 }
0x1468   :  { %v1930_v40 = vpop.f32.mrf.mxu0 }
0x146a   :  { %v2623_v9 = vpop.f32.mrf.mxu0 }
0x146c   :  { %v1933_v10 = vpop.f32.mrf.mxu0 }
0x146e   :  { %v2624_v7 = vpop.f32.mrf.mxu0 }
0x1470   :  { %v2794_v8 = vpop.eup %2793 }
0x1471   :  { %1841 = vrot.lane.b32.xlu1 %v2794_v8, %s2938_s14 }
0x14a4   :  { %v1777_v12 = vpop.f32.mrf.mxu1 }
0x14a5   :  { %v1778_v42 = vadd.f32 %v3227_v11, %v1777_v12 }
0x14a6   :  { %v2599_v27 = vpop.f32.mrf.mxu1 }
0x14a7   :  { %1783 = vst [vmem:[#allocation10 + $0x28] sm:$0xff] %v1778_v42 }
0x14a8   :  { %v1780_v13 = vpop.f32.mrf.mxu1 }
0x14aa   :  { %v2600_v58 = vpop.f32.mrf.mxu1 }
0x14ac   :  { %v1890_v46 = vpop.f32.mrf.mxu1 }
0x14ad   :  { %v1931_v14 = vadd.f32 %v1930_v40, %v1890_v46 }
0x14ae   :  { %v2615_v15 = vpop.f32.mrf.mxu1 }
0x14af   :  { %v1936_v22 = vadd.f32 %v3480_v16, %v1931_v14 }
0x14b0   :  { %v1893_v17 = vpop.f32.mrf.mxu1 }
0x14b1   :  { %2795 = vtanh.f32 %v1936_v22  ;;  %v2263_v23 = vmul.f32 -1.442695, %v1936_v22 }
0x14b2   :  { %v2616_v18 = vpop.f32.mrf.mxu1  ;;  %2797 = vpow2.f32 %v2260_v51 }
0x14be   :  { %v2796_v20 = vpop.eup %2795 }
0x14bf   :  { %1946 = vrot.lane.b32.xlu0 %v2796_v20, %s2938_s14  ;;  %v2798_v11 = vpop.eup %2797 }
0x14c0   :  { %v1835_v21 = vadd.f32 1.0, %v2798_v11 }
0x14c2   :  { %2799 = vrcp.f32 %v1835_v21 }
0x14c3   :  { %2801 = vpow2.f32 %v2263_v23 }
0x14cf   :  { %v2800_v28 = vpop.eup %2799 }
0x14d0   :  { %v2802_v24 = vpop.eup %2801  ;;  %v1839_v32 = vmul.f32 %v2800_v28, %v3430_v39 }
0x14d1   :  { %v1940_v25 = vadd.f32 1.0, %v2802_v24 }
0x14d3   :  { %2803 = vrcp.f32 %v1940_v25 }
0x14e0   :  { %v2804_v26 = vpop.eup %2803 }
0x14e1   :  { %v1944_v36 = vmul.f32 %v2804_v26, %v3435_v47 }
0x14e3   :  { %v1842_v59 = vpop.permute.xlu1 %1841 }
0x14e4   :  { %v1844_v57 = vmul.f32 %v2800_v28, %v1842_v59 }
0x14e6   :  { %1846 = vrot.lane.b32.xlu1 %v1844_v57, %s2946_s29 }
0x1531   :  { %v1947_v30 = vpop.permute.xlu0 %1946 }
0x1532   :  { %v1949_v31 = vmul.f32 %v2804_v26, %v1947_v30 }
0x1534   :  { %1951 = vrot.lane.b32.xlu0 %v1949_v31, %s2946_s29 }
0x1558   :  { %v1847_v0 = vpop.permute.xlu1 %1846 }
0x1559   :  { %v1849_v33 = vadd.f32 %v1847_v0, %v1839_v32 }
0x155b   :  { %2805 = vtanh.f32 %v1849_v33 }
0x1568   :  { %v2806_v35 = vpop.eup %2805 }
0x1569   :  { %1852 = vrot.lane.b32.xlu1 %v2806_v35, %s2938_s14 }
0x15a6   :  { %v1952_v37 = vpop.permute.xlu0 %1951 }
0x15a7   :  { %v1954_v38 = vadd.f32 %v1952_v37, %v1944_v36 }
0x15a9   :  { %2807 = vtanh.f32 %v1954_v38 }
0x15b6   :  { %v2808_v41 = vpop.eup %2807 }
0x15b7   :  { %1957 = vrot.lane.b32.xlu0 %v2808_v41, %s2938_s14 }
0x15db   :  { %v1853_v43 = vpop.permute.xlu1 %1852 }
0x15dc   :  { %v1855_v44 = vmul.f32 %v2800_v28, %v1853_v43 }
0x15de   :  { %v2009_v52 = vpack.c.bf16 %v1855_v44, %v1855_v44 }
0x15e0   :  { %2051 = vrot.lane.b32.xlu1 %v2009_v52, %s2946_s29 }
0x1629   :  { %v1958_v39 = vpop.permute.xlu0 %1957 }
0x162a   :  { %v1960_v53 = vmul.f32 %v2804_v26, %v1958_v39 }
0x162c   :  { %v1961_v56 = vpack.c.bf16 %v1960_v53, %v1960_v53 }
0x162e   :  { %1963 = vrot.lane.b32.xlu0 %v1961_v56, %s2946_s29 }
0x1652   :  { %v2052_v47 = vpop.permute.xlu1 %2051 }
0x16a0   :  { %v1964_v29 = vpop.permute.xlu0 %1963 }
0x16a1   :  { %2630 = vmatmul.mubr.msk.bf16.vlgmr.msra.gmra.mxu1 %vm317_vm7, %v1964_v29  ;;  %2638 = vmatmul.mubr.msk.bf16.vlgmr.msra.gmra.mxu0 %vm317_vm7, %v1964_v29 }
0x16a2   :  { %2642 = vmatpush3.bf16.msra.mxu1 %v3442_v45  ;;  %2645 = vmatprep.mubr.msk.bf16.mxu1 %vm2944_vm0, %v2943_v1 }
0x16a3   :  { %2643 = vmatprep.subr.bf16.mxu1 %v2943_v1  ;;  %2650 = vmatpush3.bf16.msra.mxu0 %v3463_v54 }
0x16a4   :  { %2651 = vmatprep.subr.bf16.mxu0 %v2943_v1  ;;  %2653 = vmatprep.mubr.msk.bf16.mxu0 %vm2944_vm0, %v2943_v1 }
0x16a6   :  { %2644 = vmatpush3.bf16.msra.mxu1 %v3448_v19 }
0x16a7   :  { %2652 = vmatpush3.bf16.msra.mxu0 %v3469_v5 }
0x16a9   :  { %2646 = vmatmul.mubr.msk.bf16.vlgmr.msra.gmra.mxu1 %vm317_vm7, %v2052_v47 }
0x1761   :  { %v2002_v61 = vpop.f32.mrf.mxu1  ;;  %v2044_v62 = vpop.f32.mrf.mxu0 }
0x1762   :  { %v2003_v2 = vadd.f32 %v2827_v34, %v2002_v61 }
0x1763   :  { %v2631_v45 = vpop.f32.mrf.mxu1  ;;  %v2639_v55 = vpop.f32.mrf.mxu0 }
0x1764   :  { %2008 = vst [vmem:[#allocation10 + $0x30] sm:$0xff] %v2003_v2 }
0x1765   :  { %v2005_v3 = vpop.f32.mrf.mxu1  ;;  %v2047_v4 = vpop.f32.mrf.mxu0 }
0x1767   :  { %v2632_v1 = vpop.f32.mrf.mxu1  ;;  %v2640_v54 = vpop.f32.mrf.mxu0 }
0x1769   :  { %v2090_v19 = vpop.f32.mrf.mxu1 }
0x176a   :  { %v2091_v63 = vadd.f32 %v2090_v19, %v2044_v62 }
0x176b   :  { %v2647_v5 = vpop.f32.mrf.mxu1 }
0x176c   :  { %v2096_v6 = vadd.f32 %v3480_v16, %v2091_v63 }
0x176d   :  { %v2093_v49 = vpop.f32.mrf.mxu1 }
0x176e   :  { %2809 = vtanh.f32 %v2096_v6  ;;  %v2267_v60 = vmul.f32 -1.442695, %v2096_v6 }
0x176f   :  { %v2648_v48 = vpop.f32.mrf.mxu1 }
0x1770   :  { %2811 = vpow2.f32 %v2267_v60 }
0x177b   :  { %v2810_v50 = vpop.eup %2809 }
0x177c   :  { %2106 = vrot.lane.b32.xlu0 %v2810_v50, %s2938_s14 }
0x177d   :  { %v2812_v40 = vpop.eup %2811 }
0x177e   :  { %v2100_v9 = vadd.f32 1.0, %v2812_v40 }
0x1780   :  { %2813 = vrcp.f32 %v2100_v9 }
0x178d   :  { %v2814_v10 = vpop.eup %2813 }
0x178e   :  { %v2104_v12 = vmul.f32 %v2814_v10, %v1954_v38 }
0x17ee   :  { %v2107_v7 = vpop.permute.xlu0 %2106 }
0x17ef   :  { %v2109_v8 = vmul.f32 %v2814_v10, %v2107_v7 }
0x17f1   :  { %2111 = vrot.lane.b32.xlu1 %v2109_v8, %s2946_s29 }
0x1863   :  { %v2112_v42 = vpop.permute.xlu1 %2111 }
0x1864   :  { %v2114_v27 = vadd.f32 %v2112_v42, %v2104_v12 }
0x1866   :  { %2815 = vtanh.f32 %v2114_v27 }
0x1873   :  { %v2816_v13 = vpop.eup %2815 }
0x1874   :  { %2117 = vrot.lane.b32.xlu0 %v2816_v13, %s2938_s14 }
0x18e6   :  { %v2118_v58 = vpop.permute.xlu0 %2117 }
0x18e7   :  { %v2120_v46 = vmul.f32 %v2814_v10, %v2118_v58 }
0x18e9   :  { %v2121_v14 = vpack.c.bf16 %v2120_v46, %v2120_v46 }
0x18eb   :  { %2123 = vrot.lane.b32.xlu1 %v2121_v14, %s2946_s29 }
0x195d   :  { %v2124_v15 = vpop.permute.xlu1 %2123 }
0x195e   :  { %2654 = vmatmul.mubr.msk.bf16.vlgmr.msra.gmra.mxu0 %vm317_vm7, %v2124_v15 }
0x1a1e   :  { %v2162_v16 = vpop.f32.mrf.mxu0 }
0x1a1f   :  { %v2163_v22 = vadd.f32 %v2827_v34, %v2162_v16 }
0x1a20   :  { %v2655_v17 = vpop.f32.mrf.mxu0 }
0x1a21   :  { %2168 = vst [vmem:[#allocation10 + $0x38] sm:$0xff] %v2163_v22 }
0x1a22   :  { %v2165_v18 = vpop.f32.mrf.mxu0 }
0x1a23   :  { %2919 = shalt.err (!%p2916_p10)
}
0x1a24   :  { %s2948_s14 = smov 128   ;;  %s2949_s25 = smov 8   ;;  %v2656_v51 = vpop.f32.mrf.mxu0 }
0x1a25   :  { %2180 = dma.vmem_to_hbm [thread:$0]  %s2175_s24, 1024, %s3526_s9, [#allocation4], %s2948_s14, %s2948_s14, %s2949_s25  }
0x1a26   :  { %2934 = dma.done.wait [#allocation4], 1024  }
0x1a27   :  { %2935 = vsyncadd [#allocation4], 4294966272 }
0x1a28   :  { %2184 = vsyncpa [#allocation3], 1 }
0x1a29   :  { %2185 = vsyncpa [#allocation6], 1 }
0x1a2a   :  { %2186 = vsyncpa [#allocation9], 1 }
0x1a2b   :  { %2187 = vsyncpa [#allocation4], 1 }

</bundles_post_ra>
